<compile_context>
chip_gen: v5e
topology: v5e:2x2
jax: 0.10.0
libtpu: 0.0.40
codegen_flags: <defaults>
</compile_context>

<pallas_src>
import functools

import jax
import jax.numpy as jnp
from jax import lax
from jax.experimental import pallas as pl
from jax.experimental.pallas import tpu as pltpu

HIDDEN_SIZE = 64
INPUT_SIZE = 1
OUTPUT_SIZE = 1

LANE = 128       # vreg lane width
SUBLANE = 8      # vreg sublane width
MAX_T_CHUNK = 32 # timesteps per grid step (fully unrolled inside the kernel)


def lstm_recurrence_kernel(preact_ref,   # (T_CHUNK, Bp, 4*Hp)  x@W_ih^T + b, streamed over time
                           w_hh_ref,     # (Hp, 4*Hp)           W_hh^T (zero-padded), resident
                           w_fc_ref,     # (Hp, O)              W_fc^T (zero-padded rows)
                           b_fc_ref,     # (1, O)
                           out_ref,      # (Bp, O)              written once on last grid step
                           h_sc,         # VMEM scratch (Bp, Hp), persists across grid steps
                           c_sc,         # VMEM scratch (Bp, Hp)
                           *, t_chunk, t_total, masked):
    Hp = h_sc.shape[1]

    # h0 = c0 = zeros (matches torch.zeros in forward) — init on first grid step only.
    @pl.when(pl.program_id(0) == 0)
    def _init():
        h_sc[...] = jnp.zeros_like(h_sc)
        c_sc[...] = jnp.zeros_like(c_sc)

    # Hoist the loop-invariant recurrent weight load out of the time loop.
    w_hh = w_hh_ref[...]                      # (Hp, 4*Hp), only 16 vregs at Hp=128
    t_base = pl.program_id(0) * t_chunk

    def step(t, carry):
        h, c = carry
        # Single MXU push per timestep; bias + input projection already in preact.
        gates = preact_ref[t] + jnp.dot(h, w_hh, preferred_element_type=jnp.float32)
        # Lane-aligned 128-wide gate slices (free vreg views).  PyTorch order: i, f, g, o.
        i_g = jax.nn.sigmoid(gates[:, 0 * Hp:1 * Hp])
        f_g = jax.nn.sigmoid(gates[:, 1 * Hp:2 * Hp])
        g_g = jnp.tanh(gates[:, 2 * Hp:3 * Hp])
        o_g = jax.nn.sigmoid(gates[:, 3 * Hp:4 * Hp])
        c_new = f_g * c + i_g * g_g
        h_new = o_g * jnp.tanh(c_new)
        if masked:  # only emitted when T is not a multiple of t_chunk (padded tail steps)
            valid = (t_base + t) < t_total
            h_new = jnp.where(valid, h_new, h)
            c_new = jnp.where(valid, c_new, c)
        return (h_new, c_new)

    # Fully unrolled time loop; h/c live in vregs across the chunk.
    h_fin, c_fin = lax.fori_loop(0, t_chunk, step, (h_sc[...], c_sc[...]), unroll=True)
    h_sc[...] = h_fin
    c_sc[...] = c_fin

    # FC + sigmoid epilogue: once, on the last grid step (single lane-sparse store).
    @pl.when(pl.program_id(0) == pl.num_programs(0) - 1)
    def _finalize():
        logits = (jnp.dot(h_sc[...], w_fc_ref[...], preferred_element_type=jnp.float32)
                  + b_fc_ref[...])
        out_ref[...] = jax.nn.sigmoid(logits)


def rnn_classifier_forward(x, params):
    """x: (B, T, input_size) float32, batch_first like the PyTorch module."""
    B, T, I = x.shape
    H = params["w_hh"].shape[1]          # w_hh: (4H, H)
    O = params["w_fc"].shape[0]          # w_fc: (O, H)

    Hp = pl.cdiv(H, LANE) * LANE         # pad hidden to lane width (64 -> 128)
    Bp = pl.cdiv(B, SUBLANE) * SUBLANE   # pad batch to sublane width
    t_chunk = min(T, MAX_T_CHUNK)
    n_chunks = pl.cdiv(T, t_chunk)
    T_pad = n_chunks * t_chunk
    masked = (T_pad != T)

    f32 = jnp.float32
    w_ih = params["w_ih"].astype(f32)                       # (4H, I)
    w_hh = params["w_hh"].astype(f32)                       # (4H, H)
    bias = (params["b_ih"] + params["b_hh"]).astype(f32)    # (4H,)

    def pad_gate_rows(w):
        # (4H, K) -> (4*Hp, K): zero-pad each of the 4 gate blocks from H to Hp rows.
        K = w.shape[1]
        return jnp.pad(w.reshape(4, H, K), ((0, 0), (0, Hp - H), (0, 0))).reshape(4 * Hp, K)

    w_ih_p = pad_gate_rows(w_ih)                                            # (4Hp, I)
    w_hh_p = jnp.pad(pad_gate_rows(w_hh), ((0, 0), (0, Hp - H)))            # (4Hp, Hp)
    b_p = jnp.pad(bias.reshape(4, H), ((0, 0), (0, Hp - H))).reshape(4 * Hp)

    w_hh_t = jnp.transpose(w_hh_p)                                          # (Hp, 4Hp)
    w_fc_t = jnp.pad(jnp.transpose(params["w_fc"].astype(f32)),
                     ((0, Hp - H), (0, 0)))                                 # (Hp, O)
    b_fc = params["b_fc"].astype(f32).reshape(1, O)                         # (1, O)

    # Input projection hoisted out of the recurrence: one big matmul in XLA (I=1 makes the
    # in-loop version a degenerate K=1 MXU op).  Result is time-major (T_pad, Bp, 4Hp).
    x_tm = jnp.transpose(x, (1, 0, 2)).astype(f32)                          # (T, B, I)
    x_tm = jnp.pad(x_tm, ((0, T_pad - T), (0, Bp - B), (0, 0)))             # (T_pad, Bp, I)
    preact = jnp.einsum("tbi,gi->tbg", x_tm, w_ih_p) + b_p                  # (T_pad, Bp, 4Hp)

    kernel = functools.partial(lstm_recurrence_kernel,
                               t_chunk=t_chunk, t_total=T, masked=masked)

    out_p = pl.pallas_call(
        kernel,
        out_shape=jax.ShapeDtypeStruct((Bp, O), jnp.float32),
        grid_spec=pltpu.PrefetchScalarGridSpec(
            num_scalar_prefetch=0,
            grid=(n_chunks,),
            in_specs=[
                # Pre-activations streamed over time chunks (double-buffered by Pallas).
                pl.BlockSpec((t_chunk, Bp, 4 * Hp), lambda t: (t, 0, 0)),
                # Weights / bias: same block every grid step -> resident in VMEM.
                pl.BlockSpec((Hp, 4 * Hp), lambda t: (0, 0)),
                pl.BlockSpec((Hp, O), lambda t: (0, 0)),
                pl.BlockSpec((1, O), lambda t: (0, 0)),
            ],
            out_specs=pl.BlockSpec((Bp, O), lambda t: (0, 0)),
            scratch_shapes=[
                pltpu.VMEM((Bp, Hp), jnp.float32),   # h, persists across grid steps
                pltpu.VMEM((Bp, Hp), jnp.float32),   # c
            ],
        ),
        compiler_params=pltpu.CompilerParams(
            # Time axis carries h/c state -> must be "arbitrary" (sequential).
            # TODO(synk): for large B, add a leading "parallel" batch-tile axis to use
            # both TensorCores on v7x; at B=2 it would be pure overhead.
            dimension_semantics=("arbitrary",),
            # Double-buffered chunk + resident weights are << this; fits v7x's 64 MiB VMEM.
            vmem_limit_bytes=32 * 1024 * 1024,
        ),
    )(preact, w_hh_t, w_fc_t, b_fc)

    return out_p[:B]   # drop padded batch rows


def _reference_forward(x, params):
    """Pure-JAX reference replicating torch.nn.LSTM + Linear + Sigmoid."""
    B = x.shape[0]
    H = params["w_hh"].shape[1]
    w_ih, w_hh = params["w_ih"], params["w_hh"]
    b = params["b_ih"] + params["b_hh"]

    def step(carry, x_t):
        h, c = carry
        gates = x_t @ w_ih.T + h @ w_hh.T + b
        i = jax.nn.sigmoid(gates[:, 0 * H:1 * H])
        f = jax.nn.sigmoid(gates[:, 1 * H:2 * H])
        g = jnp.tanh(gates[:, 2 * H:3 * H])
        o = jax.nn.sigmoid(gates[:, 3 * H:4 * H])
        c = f * c + i * g
        h = o * jnp.tanh(c)
        return (h, c), None

    h0 = jnp.zeros((B, H), jnp.float32)
    c0 = jnp.zeros((B, H), jnp.float32)
    (h_last, _), _ = lax.scan(step, (h0, c0), jnp.transpose(x, (1, 0, 2)))
    logits = h_last @ params["w_fc"].T + params["b_fc"]
    return jax.nn.sigmoid(logits)


def init_params(key, input_size, hidden_size, output_size):
    # Deterministic init, PyTorch-style uniform(-1/sqrt(H), 1/sqrt(H)).
    k = 1.0 / jnp.sqrt(hidden_size)
    keys = jax.random.split(key, 6)
    return {
        "w_ih": jax.random.uniform(keys[0], (4 * hidden_size, input_size), jnp.float32, -k, k),
        "w_hh": jax.random.uniform(keys[1], (4 * hidden_size, hidden_size), jnp.float32, -k, k),
        "b_ih": jax.random.uniform(keys[2], (4 * hidden_size,), jnp.float32, -k, k),
        "b_hh": jax.random.uniform(keys[3], (4 * hidden_size,), jnp.float32, -k, k),
        "w_fc": jax.random.uniform(keys[4], (output_size, hidden_size), jnp.float32, -k, k),
        "b_fc": jax.random.uniform(keys[5], (output_size,), jnp.float32, -k, k),
    }


if __name__ == "__main__":
    key = jax.random.PRNGKey(0)
    k_param, k_x = jax.random.split(key)

    B, T = 2, 8
    params = init_params(k_param, INPUT_SIZE, HIDDEN_SIZE, OUTPUT_SIZE)
    x = jax.random.normal(k_x, (B, T, INPUT_SIZE), jnp.float32)

    out = rnn_classifier_forward(x, params)
    out = jax.block_until_ready(out)

    ref = _reference_forward(x, params)
    assert out.shape == (B, OUTPUT_SIZE), out.shape
    assert jnp.allclose(out, ref, atol=1e-5, rtol=1e-5), (out, ref)

    print("KERNEL_OK")
</pallas_src>

<mosaic_0001>
module attributes {stable_mosaic.version = 11 : i64} {
  func.func @lstm_recurrence_kernel(%arg0: i32, %arg1: memref<8x8x512xf32, #tpu.memory_space<vmem>>, %arg2: memref<128x512xf32, #tpu.memory_space<vmem>>, %arg3: memref<128x1xf32, #tpu.memory_space<vmem>>, %arg4: memref<1x1xf32, #tpu.memory_space<vmem>>, %arg5: memref<8x1xf32, #tpu.memory_space<vmem>>, %arg6: memref<8x128xf32, #tpu.memory_space<vmem>>, %arg7: memref<8x128xf32, #tpu.memory_space<vmem>>) attributes {dimension_semantics = [#tpu.dimension_semantics<arbitrary>], iteration_bounds = array<i64: 1>, scalar_prefetch = 0 : i64, scratch_operands = 2 : i64, tpu.core_type = #tpu.core_type<tc>, window_params = [{transform_indices = @transform_0, window_bounds = array<i64: 8, 8, 512>}, {pipeline_mode = #tpu.pipeline_mode<synchronous>, transform_indices = @transform_1, window_bounds = array<i64: 128, 512>}, {pipeline_mode = #tpu.pipeline_mode<synchronous>, transform_indices = @transform_2, window_bounds = array<i64: 128, 1>}, {pipeline_mode = #tpu.pipeline_mode<synchronous>, transform_indices = @transform_3, window_bounds = array<i64: 1, 1>}, {pipeline_mode = #tpu.pipeline_mode<synchronous>, transform_indices = @transform_4, window_bounds = array<i64: 8, 1>}]} {
    %c0_i32 = arith.constant 0 : i32
    %0 = arith.cmpi eq, %arg0, %c0_i32 : i32
    %1 = arith.extui %0 : i1 to i32
    %c0_i32_0 = arith.constant 0 : i32
    %2 = arith.cmpi ne, %1, %c0_i32_0 : i32
    scf.if %2 {
      %cst_60 = arith.constant 0.000000e+00 : f32
      %251 = vector.broadcast %cst_60 : f32 to vector<8x128xf32>
      %c0_61 = arith.constant 0 : index
      %c0_62 = arith.constant 0 : index
      %252 = vector.load %arg6[%c0_61, %c0_62] : memref<8x128xf32, #tpu.memory_space<vmem>>, vector<8x128xf32>
      tpu.vector_store %arg6[%c0_61, %c0_62], %251 {strides = array<i32>} : memref<8x128xf32, #tpu.memory_space<vmem>>, vector<8x128xf32>,
      %cst_63 = arith.constant 0.000000e+00 : f32
      %253 = vector.broadcast %cst_63 : f32 to vector<8x128xf32>
      %c0_64 = arith.constant 0 : index
      %c0_65 = arith.constant 0 : index
      %254 = vector.load %arg7[%c0_64, %c0_65] : memref<8x128xf32, #tpu.memory_space<vmem>>, vector<8x128xf32>
      tpu.vector_store %arg7[%c0_64, %c0_65], %253 {strides = array<i32>} : memref<8x128xf32, #tpu.memory_space<vmem>>, vector<8x128xf32>,
    } else {
    }
    %c0 = arith.constant 0 : index
    %c0_1 = arith.constant 0 : index
    %3 = vector.load %arg2[%c0, %c0_1] : memref<128x512xf32, #tpu.memory_space<vmem>>, vector<128x512xf32>
    %c0_2 = arith.constant 0 : index
    %c0_3 = arith.constant 0 : index
    %4 = vector.load %arg6[%c0_2, %c0_3] : memref<8x128xf32, #tpu.memory_space<vmem>>, vector<8x128xf32>
    %c0_4 = arith.constant 0 : index
    %c0_5 = arith.constant 0 : index
    %5 = vector.load %arg7[%c0_4, %c0_5] : memref<8x128xf32, #tpu.memory_space<vmem>>, vector<8x128xf32>
    %c0_i32_6 = arith.constant 0 : i32
    %6 = arith.index_cast %c0_i32_6 : i32 to index
    %c0_7 = arith.constant 0 : index
    %c0_8 = arith.constant 0 : index
    %7 = vector.load %arg1[%6, %c0_7, %c0_8] : memref<8x8x512xf32, #tpu.memory_space<vmem>>, vector<1x8x512xf32>
    %8 = vector.shape_cast %7 : vector<1x8x512xf32> to vector<8x512xf32>
    %cst = arith.constant dense<0.000000e+00> : vector<8x512xf32>
    %9 = tpu.matmul %4, %3, %cst {dimension_numbers = #tpu.dot_dimension_numbers<[1], [0], [0], [1], [0, 0, 1, 1], [], []>} : vector<8x128xf32>, vector<128x512xf32>, vector<8x512xf32> -> vector<8x512xf32>
    %10 = arith.addf %8, %9 : vector<8x512xf32>
    %11 = vector.extract_strided_slice %10 {offsets = [0, 0], sizes = [8, 128], strides = [1, 1]} : vector<8x512xf32> to vector<8x128xf32>
    %12 = arith.negf %11 : vector<8x128xf32>
    %13 = math.exp %12 : vector<8x128xf32>
    %cst_9 = arith.constant 1.000000e+00 : f32
    %14 = vector.broadcast %cst_9 : f32 to vector<8x128xf32>
    %15 = arith.addf %14, %13 : vector<8x128xf32>
    %16 = arith.divf %14, %15 : vector<8x128xf32>
    %17 = vector.extract_strided_slice %10 {offsets = [0, 128], sizes = [8, 128], strides = [1, 1]} : vector<8x512xf32> to vector<8x128xf32>
    %18 = arith.negf %17 : vector<8x128xf32>
    %19 = math.exp %18 : vector<8x128xf32>
    %cst_10 = arith.constant 1.000000e+00 : f32
    %20 = vector.broadcast %cst_10 : f32 to vector<8x128xf32>
    %21 = arith.addf %20, %19 : vector<8x128xf32>
    %22 = arith.divf %20, %21 : vector<8x128xf32>
    %23 = vector.extract_strided_slice %10 {offsets = [0, 256], sizes = [8, 128], strides = [1, 1]} : vector<8x512xf32> to vector<8x128xf32>
    %24 = math.tanh %23 : vector<8x128xf32>
    %25 = vector.extract_strided_slice %10 {offsets = [0, 384], sizes = [8, 128], strides = [1, 1]} : vector<8x512xf32> to vector<8x128xf32>
    %26 = arith.negf %25 : vector<8x128xf32>
    %27 = math.exp %26 : vector<8x128xf32>
    %cst_11 = arith.constant 1.000000e+00 : f32
    %28 = vector.broadcast %cst_11 : f32 to vector<8x128xf32>
    %29 = arith.addf %28, %27 : vector<8x128xf32>
    %30 = arith.divf %28, %29 : vector<8x128xf32>
    %31 = arith.mulf %22, %5 : vector<8x128xf32>
    %32 = arith.mulf %16, %24 : vector<8x128xf32>
    %33 = arith.addf %31, %32 : vector<8x128xf32>
    %34 = math.tanh %33 : vector<8x128xf32>
    %35 = arith.mulf %30, %34 : vector<8x128xf32>
    %c1_i32 = arith.constant 1 : i32
    %36 = arith.index_cast %c1_i32 : i32 to index
    %c0_12 = arith.constant 0 : index
    %c0_13 = arith.constant 0 : index
    %37 = vector.load %arg1[%36, %c0_12, %c0_13] : memref<8x8x512xf32, #tpu.memory_space<vmem>>, vector<1x8x512xf32>
    %38 = vector.shape_cast %37 : vector<1x8x512xf32> to vector<8x512xf32>
    %cst_14 = arith.constant dense<0.000000e+00> : vector<8x512xf32>
    %39 = tpu.matmul %35, %3, %cst_14 {dimension_numbers = #tpu.dot_dimension_numbers<[1], [0], [0], [1], [0, 0, 1, 1], [], []>} : vector<8x128xf32>, vector<128x512xf32>, vector<8x512xf32> -> vector<8x512xf32>
    %40 = arith.addf %38, %39 : vector<8x512xf32>
    %41 = vector.extract_strided_slice %40 {offsets = [0, 0], sizes = [8, 128], strides = [1, 1]} : vector<8x512xf32> to vector<8x128xf32>
    %42 = arith.negf %41 : vector<8x128xf32>
    %43 = math.exp %42 : vector<8x128xf32>
    %cst_15 = arith.constant 1.000000e+00 : f32
    %44 = vector.broadcast %cst_15 : f32 to vector<8x128xf32>
    %45 = arith.addf %44, %43 : vector<8x128xf32>
    %46 = arith.divf %44, %45 : vector<8x128xf32>
    %47 = vector.extract_strided_slice %40 {offsets = [0, 128], sizes = [8, 128], strides = [1, 1]} : vector<8x512xf32> to vector<8x128xf32>
    %48 = arith.negf %47 : vector<8x128xf32>
    %49 = math.exp %48 : vector<8x128xf32>
    %cst_16 = arith.constant 1.000000e+00 : f32
    %50 = vector.broadcast %cst_16 : f32 to vector<8x128xf32>
    %51 = arith.addf %50, %49 : vector<8x128xf32>
    %52 = arith.divf %50, %51 : vector<8x128xf32>
    %53 = vector.extract_strided_slice %40 {offsets = [0, 256], sizes = [8, 128], strides = [1, 1]} : vector<8x512xf32> to vector<8x128xf32>
    %54 = math.tanh %53 : vector<8x128xf32>
    %55 = vector.extract_strided_slice %40 {offsets = [0, 384], sizes = [8, 128], strides = [1, 1]} : vector<8x512xf32> to vector<8x128xf32>
    %56 = arith.negf %55 : vector<8x128xf32>
    %57 = math.exp %56 : vector<8x128xf32>
    %cst_17 = arith.constant 1.000000e+00 : f32
    %58 = vector.broadcast %cst_17 : f32 to vector<8x128xf32>
    %59 = arith.addf %58, %57 : vector<8x128xf32>
    %60 = arith.divf %58, %59 : vector<8x128xf32>
    %61 = arith.mulf %52, %33 : vector<8x128xf32>
    %62 = arith.mulf %46, %54 : vector<8x128xf32>
    %63 = arith.addf %61, %62 : vector<8x128xf32>
    %64 = math.tanh %63 : vector<8x128xf32>
    %65 = arith.mulf %60, %64 : vector<8x128xf32>
    %c2_i32 = arith.constant 2 : i32
    %66 = arith.index_cast %c2_i32 : i32 to index
    %c0_18 = arith.constant 0 : index
    %c0_19 = arith.constant 0 : index
    %67 = vector.load %arg1[%66, %c0_18, %c0_19] : memref<8x8x512xf32, #tpu.memory_space<vmem>>, vector<1x8x512xf32>
    %68 = vector.shape_cast %67 : vector<1x8x512xf32> to vector<8x512xf32>
    %cst_20 = arith.constant dense<0.000000e+00> : vector<8x512xf32>
    %69 = tpu.matmul %65, %3, %cst_20 {dimension_numbers = #tpu.dot_dimension_numbers<[1], [0], [0], [1], [0, 0, 1, 1], [], []>} : vector<8x128xf32>, vector<128x512xf32>, vector<8x512xf32> -> vector<8x512xf32>
    %70 = arith.addf %68, %69 : vector<8x512xf32>
    %71 = vector.extract_strided_slice %70 {offsets = [0, 0], sizes = [8, 128], strides = [1, 1]} : vector<8x512xf32> to vector<8x128xf32>
    %72 = arith.negf %71 : vector<8x128xf32>
    %73 = math.exp %72 : vector<8x128xf32>
    %cst_21 = arith.constant 1.000000e+00 : f32
    %74 = vector.broadcast %cst_21 : f32 to vector<8x128xf32>
    %75 = arith.addf %74, %73 : vector<8x128xf32>
    %76 = arith.divf %74, %75 : vector<8x128xf32>
    %77 = vector.extract_strided_slice %70 {offsets = [0, 128], sizes = [8, 128], strides = [1, 1]} : vector<8x512xf32> to vector<8x128xf32>
    %78 = arith.negf %77 : vector<8x128xf32>
    %79 = math.exp %78 : vector<8x128xf32>
    %cst_22 = arith.constant 1.000000e+00 : f32
    %80 = vector.broadcast %cst_22 : f32 to vector<8x128xf32>
    %81 = arith.addf %80, %79 : vector<8x128xf32>
    %82 = arith.divf %80, %81 : vector<8x128xf32>
    %83 = vector.extract_strided_slice %70 {offsets = [0, 256], sizes = [8, 128], strides = [1, 1]} : vector<8x512xf32> to vector<8x128xf32>
    %84 = math.tanh %83 : vector<8x128xf32>
    %85 = vector.extract_strided_slice %70 {offsets = [0, 384], sizes = [8, 128], strides = [1, 1]} : vector<8x512xf32> to vector<8x128xf32>
    %86 = arith.negf %85 : vector<8x128xf32>
    %87 = math.exp %86 : vector<8x128xf32>
    %cst_23 = arith.constant 1.000000e+00 : f32
    %88 = vector.broadcast %cst_23 : f32 to vector<8x128xf32>
    %89 = arith.addf %88, %87 : vector<8x128xf32>
    %90 = arith.divf %88, %89 : vector<8x128xf32>
    %91 = arith.mulf %82, %63 : vector<8x128xf32>
    %92 = arith.mulf %76, %84 : vector<8x128xf32>
    %93 = arith.addf %91, %92 : vector<8x128xf32>
    %94 = math.tanh %93 : vector<8x128xf32>
    %95 = arith.mulf %90, %94 : vector<8x128xf32>
    %c3_i32 = arith.constant 3 : i32
    %96 = arith.index_cast %c3_i32 : i32 to index
    %c0_24 = arith.constant 0 : index
    %c0_25 = arith.constant 0 : index
    %97 = vector.load %arg1[%96, %c0_24, %c0_25] : memref<8x8x512xf32, #tpu.memory_space<vmem>>, vector<1x8x512xf32>
    %98 = vector.shape_cast %97 : vector<1x8x512xf32> to vector<8x512xf32>
    %cst_26 = arith.constant dense<0.000000e+00> : vector<8x512xf32>
    %99 = tpu.matmul %95, %3, %cst_26 {dimension_numbers = #tpu.dot_dimension_numbers<[1], [0], [0], [1], [0, 0, 1, 1], [], []>} : vector<8x128xf32>, vector<128x512xf32>, vector<8x512xf32> -> vector<8x512xf32>
    %100 = arith.addf %98, %99 : vector<8x512xf32>
    %101 = vector.extract_strided_slice %100 {offsets = [0, 0], sizes = [8, 128], strides = [1, 1]} : vector<8x512xf32> to vector<8x128xf32>
    %102 = arith.negf %101 : vector<8x128xf32>
    %103 = math.exp %102 : vector<8x128xf32>
    %cst_27 = arith.constant 1.000000e+00 : f32
    %104 = vector.broadcast %cst_27 : f32 to vector<8x128xf32>
    %105 = arith.addf %104, %103 : vector<8x128xf32>
    %106 = arith.divf %104, %105 : vector<8x128xf32>
    %107 = vector.extract_strided_slice %100 {offsets = [0, 128], sizes = [8, 128], strides = [1, 1]} : vector<8x512xf32> to vector<8x128xf32>
    %108 = arith.negf %107 : vector<8x128xf32>
    %109 = math.exp %108 : vector<8x128xf32>
    %cst_28 = arith.constant 1.000000e+00 : f32
    %110 = vector.broadcast %cst_28 : f32 to vector<8x128xf32>
    %111 = arith.addf %110, %109 : vector<8x128xf32>
    %112 = arith.divf %110, %111 : vector<8x128xf32>
    %113 = vector.extract_strided_slice %100 {offsets = [0, 256], sizes = [8, 128], strides = [1, 1]} : vector<8x512xf32> to vector<8x128xf32>
    %114 = math.tanh %113 : vector<8x128xf32>
    %115 = vector.extract_strided_slice %100 {offsets = [0, 384], sizes = [8, 128], strides = [1, 1]} : vector<8x512xf32> to vector<8x128xf32>
    %116 = arith.negf %115 : vector<8x128xf32>
    %117 = math.exp %116 : vector<8x128xf32>
    %cst_29 = arith.constant 1.000000e+00 : f32
    %118 = vector.broadcast %cst_29 : f32 to vector<8x128xf32>
    %119 = arith.addf %118, %117 : vector<8x128xf32>
    %120 = arith.divf %118, %119 : vector<8x128xf32>
    %121 = arith.mulf %112, %93 : vector<8x128xf32>
    %122 = arith.mulf %106, %114 : vector<8x128xf32>
    %123 = arith.addf %121, %122 : vector<8x128xf32>
    %124 = math.tanh %123 : vector<8x128xf32>
    %125 = arith.mulf %120, %124 : vector<8x128xf32>
    %c4_i32 = arith.constant 4 : i32
    %126 = arith.index_cast %c4_i32 : i32 to index
    %c0_30 = arith.constant 0 : index
    %c0_31 = arith.constant 0 : index
    %127 = vector.load %arg1[%126, %c0_30, %c0_31] : memref<8x8x512xf32, #tpu.memory_space<vmem>>, vector<1x8x512xf32>
    %128 = vector.shape_cast %127 : vector<1x8x512xf32> to vector<8x512xf32>
    %cst_32 = arith.constant dense<0.000000e+00> : vector<8x512xf32>
    %129 = tpu.matmul %125, %3, %cst_32 {dimension_numbers = #tpu.dot_dimension_numbers<[1], [0], [0], [1], [0, 0, 1, 1], [], []>} : vector<8x128xf32>, vector<128x512xf32>, vector<8x512xf32> -> vector<8x512xf32>
    %130 = arith.addf %128, %129 : vector<8x512xf32>
    %131 = vector.extract_strided_slice %130 {offsets = [0, 0], sizes = [8, 128], strides = [1, 1]} : vector<8x512xf32> to vector<8x128xf32>
    %132 = arith.negf %131 : vector<8x128xf32>
    %133 = math.exp %132 : vector<8x128xf32>
    %cst_33 = arith.constant 1.000000e+00 : f32
    %134 = vector.broadcast %cst_33 : f32 to vector<8x128xf32>
    %135 = arith.addf %134, %133 : vector<8x128xf32>
    %136 = arith.divf %134, %135 : vector<8x128xf32>
    %137 = vector.extract_strided_slice %130 {offsets = [0, 128], sizes = [8, 128], strides = [1, 1]} : vector<8x512xf32> to vector<8x128xf32>
    %138 = arith.negf %137 : vector<8x128xf32>
    %139 = math.exp %138 : vector<8x128xf32>
    %cst_34 = arith.constant 1.000000e+00 : f32
    %140 = vector.broadcast %cst_34 : f32 to vector<8x128xf32>
    %141 = arith.addf %140, %139 : vector<8x128xf32>
    %142 = arith.divf %140, %141 : vector<8x128xf32>
    %143 = vector.extract_strided_slice %130 {offsets = [0, 256], sizes = [8, 128], strides = [1, 1]} : vector<8x512xf32> to vector<8x128xf32>
    %144 = math.tanh %143 : vector<8x128xf32>
    %145 = vector.extract_strided_slice %130 {offsets = [0, 384], sizes = [8, 128], strides = [1, 1]} : vector<8x512xf32> to vector<8x128xf32>
    %146 = arith.negf %145 : vector<8x128xf32>
    %147 = math.exp %146 : vector<8x128xf32>
    %cst_35 = arith.constant 1.000000e+00 : f32
    %148 = vector.broadcast %cst_35 : f32 to vector<8x128xf32>
    %149 = arith.addf %148, %147 : vector<8x128xf32>
    %150 = arith.divf %148, %149 : vector<8x128xf32>
    %151 = arith.mulf %142, %123 : vector<8x128xf32>
    %152 = arith.mulf %136, %144 : vector<8x128xf32>
    %153 = arith.addf %151, %152 : vector<8x128xf32>
    %154 = math.tanh %153 : vector<8x128xf32>
    %155 = arith.mulf %150, %154 : vector<8x128xf32>
    %c5_i32 = arith.constant 5 : i32
    %156 = arith.index_cast %c5_i32 : i32 to index
    %c0_36 = arith.constant 0 : index
    %c0_37 = arith.constant 0 : index
    %157 = vector.load %arg1[%156, %c0_36, %c0_37] : memref<8x8x512xf32, #tpu.memory_space<vmem>>, vector<1x8x512xf32>
    %158 = vector.shape_cast %157 : vector<1x8x512xf32> to vector<8x512xf32>
    %cst_38 = arith.constant dense<0.000000e+00> : vector<8x512xf32>
    %159 = tpu.matmul %155, %3, %cst_38 {dimension_numbers = #tpu.dot_dimension_numbers<[1], [0], [0], [1], [0, 0, 1, 1], [], []>} : vector<8x128xf32>, vector<128x512xf32>, vector<8x512xf32> -> vector<8x512xf32>
    %160 = arith.addf %158, %159 : vector<8x512xf32>
    %161 = vector.extract_strided_slice %160 {offsets = [0, 0], sizes = [8, 128], strides = [1, 1]} : vector<8x512xf32> to vector<8x128xf32>
    %162 = arith.negf %161 : vector<8x128xf32>
    %163 = math.exp %162 : vector<8x128xf32>
    %cst_39 = arith.constant 1.000000e+00 : f32
    %164 = vector.broadcast %cst_39 : f32 to vector<8x128xf32>
    %165 = arith.addf %164, %163 : vector<8x128xf32>
    %166 = arith.divf %164, %165 : vector<8x128xf32>
    %167 = vector.extract_strided_slice %160 {offsets = [0, 128], sizes = [8, 128], strides = [1, 1]} : vector<8x512xf32> to vector<8x128xf32>
    %168 = arith.negf %167 : vector<8x128xf32>
    %169 = math.exp %168 : vector<8x128xf32>
    %cst_40 = arith.constant 1.000000e+00 : f32
    %170 = vector.broadcast %cst_40 : f32 to vector<8x128xf32>
    %171 = arith.addf %170, %169 : vector<8x128xf32>
    %172 = arith.divf %170, %171 : vector<8x128xf32>
    %173 = vector.extract_strided_slice %160 {offsets = [0, 256], sizes = [8, 128], strides = [1, 1]} : vector<8x512xf32> to vector<8x128xf32>
    %174 = math.tanh %173 : vector<8x128xf32>
    %175 = vector.extract_strided_slice %160 {offsets = [0, 384], sizes = [8, 128], strides = [1, 1]} : vector<8x512xf32> to vector<8x128xf32>
    %176 = arith.negf %175 : vector<8x128xf32>
    %177 = math.exp %176 : vector<8x128xf32>
    %cst_41 = arith.constant 1.000000e+00 : f32
    %178 = vector.broadcast %cst_41 : f32 to vector<8x128xf32>
    %179 = arith.addf %178, %177 : vector<8x128xf32>
    %180 = arith.divf %178, %179 : vector<8x128xf32>
    %181 = arith.mulf %172, %153 : vector<8x128xf32>
    %182 = arith.mulf %166, %174 : vector<8x128xf32>
    %183 = arith.addf %181, %182 : vector<8x128xf32>
    %184 = math.tanh %183 : vector<8x128xf32>
    %185 = arith.mulf %180, %184 : vector<8x128xf32>
    %c6_i32 = arith.constant 6 : i32
    %186 = arith.index_cast %c6_i32 : i32 to index
    %c0_42 = arith.constant 0 : index
    %c0_43 = arith.constant 0 : index
    %187 = vector.load %arg1[%186, %c0_42, %c0_43] : memref<8x8x512xf32, #tpu.memory_space<vmem>>, vector<1x8x512xf32>
    %188 = vector.shape_cast %187 : vector<1x8x512xf32> to vector<8x512xf32>
    %cst_44 = arith.constant dense<0.000000e+00> : vector<8x512xf32>
    %189 = tpu.matmul %185, %3, %cst_44 {dimension_numbers = #tpu.dot_dimension_numbers<[1], [0], [0], [1], [0, 0, 1, 1], [], []>} : vector<8x128xf32>, vector<128x512xf32>, vector<8x512xf32> -> vector<8x512xf32>
    %190 = arith.addf %188, %189 : vector<8x512xf32>
    %191 = vector.extract_strided_slice %190 {offsets = [0, 0], sizes = [8, 128], strides = [1, 1]} : vector<8x512xf32> to vector<8x128xf32>
    %192 = arith.negf %191 : vector<8x128xf32>
    %193 = math.exp %192 : vector<8x128xf32>
    %cst_45 = arith.constant 1.000000e+00 : f32
    %194 = vector.broadcast %cst_45 : f32 to vector<8x128xf32>
    %195 = arith.addf %194, %193 : vector<8x128xf32>
    %196 = arith.divf %194, %195 : vector<8x128xf32>
    %197 = vector.extract_strided_slice %190 {offsets = [0, 128], sizes = [8, 128], strides = [1, 1]} : vector<8x512xf32> to vector<8x128xf32>
    %198 = arith.negf %197 : vector<8x128xf32>
    %199 = math.exp %198 : vector<8x128xf32>
    %cst_46 = arith.constant 1.000000e+00 : f32
    %200 = vector.broadcast %cst_46 : f32 to vector<8x128xf32>
    %201 = arith.addf %200, %199 : vector<8x128xf32>
    %202 = arith.divf %200, %201 : vector<8x128xf32>
    %203 = vector.extract_strided_slice %190 {offsets = [0, 256], sizes = [8, 128], strides = [1, 1]} : vector<8x512xf32> to vector<8x128xf32>
    %204 = math.tanh %203 : vector<8x128xf32>
    %205 = vector.extract_strided_slice %190 {offsets = [0, 384], sizes = [8, 128], strides = [1, 1]} : vector<8x512xf32> to vector<8x128xf32>
    %206 = arith.negf %205 : vector<8x128xf32>
    %207 = math.exp %206 : vector<8x128xf32>
    %cst_47 = arith.constant 1.000000e+00 : f32
    %208 = vector.broadcast %cst_47 : f32 to vector<8x128xf32>
    %209 = arith.addf %208, %207 : vector<8x128xf32>
    %210 = arith.divf %208, %209 : vector<8x128xf32>
    %211 = arith.mulf %202, %183 : vector<8x128xf32>
    %212 = arith.mulf %196, %204 : vector<8x128xf32>
    %213 = arith.addf %211, %212 : vector<8x128xf32>
    %214 = math.tanh %213 : vector<8x128xf32>
    %215 = arith.mulf %210, %214 : vector<8x128xf32>
    %c7_i32 = arith.constant 7 : i32
    %216 = arith.index_cast %c7_i32 : i32 to index
    %c0_48 = arith.constant 0 : index
    %c0_49 = arith.constant 0 : index
    %217 = vector.load %arg1[%216, %c0_48, %c0_49] : memref<8x8x512xf32, #tpu.memory_space<vmem>>, vector<1x8x512xf32>
    %218 = vector.shape_cast %217 : vector<1x8x512xf32> to vector<8x512xf32>
    %cst_50 = arith.constant dense<0.000000e+00> : vector<8x512xf32>
    %219 = tpu.matmul %215, %3, %cst_50 {dimension_numbers = #tpu.dot_dimension_numbers<[1], [0], [0], [1], [0, 0, 1, 1], [], []>} : vector<8x128xf32>, vector<128x512xf32>, vector<8x512xf32> -> vector<8x512xf32>
    %220 = arith.addf %218, %219 : vector<8x512xf32>
    %221 = vector.extract_strided_slice %220 {offsets = [0, 0], sizes = [8, 128], strides = [1, 1]} : vector<8x512xf32> to vector<8x128xf32>
    %222 = arith.negf %221 : vector<8x128xf32>
    %223 = math.exp %222 : vector<8x128xf32>
    %cst_51 = arith.constant 1.000000e+00 : f32
    %224 = vector.broadcast %cst_51 : f32 to vector<8x128xf32>
    %225 = arith.addf %224, %223 : vector<8x128xf32>
    %226 = arith.divf %224, %225 : vector<8x128xf32>
    %227 = vector.extract_strided_slice %220 {offsets = [0, 128], sizes = [8, 128], strides = [1, 1]} : vector<8x512xf32> to vector<8x128xf32>
    %228 = arith.negf %227 : vector<8x128xf32>
    %229 = math.exp %228 : vector<8x128xf32>
    %cst_52 = arith.constant 1.000000e+00 : f32
    %230 = vector.broadcast %cst_52 : f32 to vector<8x128xf32>
    %231 = arith.addf %230, %229 : vector<8x128xf32>
    %232 = arith.divf %230, %231 : vector<8x128xf32>
    %233 = vector.extract_strided_slice %220 {offsets = [0, 256], sizes = [8, 128], strides = [1, 1]} : vector<8x512xf32> to vector<8x128xf32>
    %234 = math.tanh %233 : vector<8x128xf32>
    %235 = vector.extract_strided_slice %220 {offsets = [0, 384], sizes = [8, 128], strides = [1, 1]} : vector<8x512xf32> to vector<8x128xf32>
    %236 = arith.negf %235 : vector<8x128xf32>
    %237 = math.exp %236 : vector<8x128xf32>
    %cst_53 = arith.constant 1.000000e+00 : f32
    %238 = vector.broadcast %cst_53 : f32 to vector<8x128xf32>
    %239 = arith.addf %238, %237 : vector<8x128xf32>
    %240 = arith.divf %238, %239 : vector<8x128xf32>
    %241 = arith.mulf %232, %213 : vector<8x128xf32>
    %242 = arith.mulf %226, %234 : vector<8x128xf32>
    %243 = arith.addf %241, %242 : vector<8x128xf32>
    %244 = math.tanh %243 : vector<8x128xf32>
    %245 = arith.mulf %240, %244 : vector<8x128xf32>
    %c8_i32 = arith.constant 8 : i32
    %c0_54 = arith.constant 0 : index
    %c0_55 = arith.constant 0 : index
    %246 = vector.load %arg6[%c0_54, %c0_55] : memref<8x128xf32, #tpu.memory_space<vmem>>, vector<8x128xf32>
    tpu.vector_store %arg6[%c0_54, %c0_55], %245 {strides = array<i32>} : memref<8x128xf32, #tpu.memory_space<vmem>>, vector<8x128xf32>,
    %c0_56 = arith.constant 0 : index
    %c0_57 = arith.constant 0 : index
    %247 = vector.load %arg7[%c0_56, %c0_57] : memref<8x128xf32, #tpu.memory_space<vmem>>, vector<8x128xf32>
    tpu.vector_store %arg7[%c0_56, %c0_57], %243 {strides = array<i32>} : memref<8x128xf32, #tpu.memory_space<vmem>>, vector<8x128xf32>,
    %c0_i32_58 = arith.constant 0 : i32
    %248 = arith.cmpi eq, %arg0, %c0_i32_58 : i32
    %249 = arith.extui %248 : i1 to i32
    %c0_i32_59 = arith.constant 0 : i32
    %250 = arith.cmpi ne, %249, %c0_i32_59 : i32
    scf.if %250 {
      %c0_60 = arith.constant 0 : index
      %c0_61 = arith.constant 0 : index
      %251 = vector.load %arg6[%c0_60, %c0_61] : memref<8x128xf32, #tpu.memory_space<vmem>>, vector<8x128xf32>
      %c0_62 = arith.constant 0 : index
      %c0_63 = arith.constant 0 : index
      %252 = vector.load %arg3[%c0_62, %c0_63] : memref<128x1xf32, #tpu.memory_space<vmem>>, vector<128x1xf32>
      %cst_64 = arith.constant dense<0.000000e+00> : vector<8x1xf32>
      %253 = tpu.matmul %251, %252, %cst_64 {dimension_numbers = #tpu.dot_dimension_numbers<[1], [0], [0], [1], [0, 0, 1, 1], [], []>} : vector<8x128xf32>, vector<128x1xf32>, vector<8x1xf32> -> vector<8x1xf32>
      %c0_65 = arith.constant 0 : index
      %c0_66 = arith.constant 0 : index
      %254 = vector.load %arg4[%c0_65, %c0_66] : memref<1x1xf32, #tpu.memory_space<vmem>>, vector<1x1xf32>
      %255 = vector.broadcast %254 : vector<1x1xf32> to vector<8x1xf32>
      %256 = arith.addf %253, %255 : vector<8x1xf32>
      %257 = arith.negf %256 : vector<8x1xf32>
      %258 = math.exp %257 : vector<8x1xf32>
      %cst_67 = arith.constant 1.000000e+00 : f32
      %259 = vector.broadcast %cst_67 : f32 to vector<8x1xf32>
      %260 = arith.addf %259, %258 : vector<8x1xf32>
      %261 = arith.divf %259, %260 : vector<8x1xf32>
      %c0_68 = arith.constant 0 : index
      %c0_69 = arith.constant 0 : index
      %262 = vector.load %arg5[%c0_68, %c0_69] : memref<8x1xf32, #tpu.memory_space<vmem>>, vector<8x1xf32>
      tpu.vector_store %arg5[%c0_68, %c0_69], %261 {strides = array<i32>} : memref<8x1xf32, #tpu.memory_space<vmem>>, vector<8x1xf32>,
    } else {
    }
    return
  }
  func.func @transform_0(%arg0: i32) -> (i32, i32, i32) {
    %c0_i32 = arith.constant 0 : i32
    %c0_i32_0 = arith.constant 0 : i32
    %c0_i32_1 = arith.constant 0 : i32
    return %arg0, %c0_i32, %c0_i32_0 : i32, i32, i32
  }
  func.func @transform_1(%arg0: i32) -> (i32, i32) {
    %c0_i32 = arith.constant 0 : i32
    %c0_i32_0 = arith.constant 0 : i32
    %c0_i32_1 = arith.constant 0 : i32
    return %c0_i32, %c0_i32_0 : i32, i32
  }
  func.func @transform_2(%arg0: i32) -> (i32, i32) {
    %c0_i32 = arith.constant 0 : i32
    %c0_i32_0 = arith.constant 0 : i32
    %c0_i32_1 = arith.constant 0 : i32
    return %c0_i32, %c0_i32_0 : i32, i32
  }
  func.func @transform_3(%arg0: i32) -> (i32, i32) {
    %c0_i32 = arith.constant 0 : i32
    %c0_i32_0 = arith.constant 0 : i32
    %c0_i32_1 = arith.constant 0 : i32
    return %c0_i32, %c0_i32_0 : i32, i32
  }
  func.func @transform_4(%arg0: i32) -> (i32, i32) {
    %c0_i32 = arith.constant 0 : i32
    %c0_i32_0 = arith.constant 0 : i32
    %c0_i32_1 = arith.constant 0 : i32
    return %c0_i32, %c0_i32_0 : i32, i32
  }
}

</mosaic_0001>

<bundles_post_ra>
// kernel: tpu_custom_call.1
= control target key start
LH: loop header
LB: loop body
LE: loop exit
PB: predicated region body
PF: predicated region fallthrough
CT: control target
= control target key end

     0   :  { %s2576_s0 = inlined_call_operand.hbm [shape: f32[8,8,512], index: 0, kind: input, shape index: {}]   ;;  %s2577_s1 = inlined_call_operand.hbm [shape: f32[128,512], index: 1, kind: input, shape index: {}]   ;;  %s2578_s2 = inlined_call_operand.vmem [shape: f32[128,1], index: 2, kind: input, shape index: {}]   ;;  %s2579_s3 = inlined_call_operand.<no memory space> [shape: f32[1,1], index: 3, kind: input, shape index: {}]   ;;  %s2580_s4 = inlined_call_operand.vmem [shape: f32[8,1], index: 4, kind: output, shape index: {}]  }
   0x1   :  { %v9_v0 = vstv %s2579_s3 }
   0x2   :  { %10 = vst [vmem:[#allocation4] sm:$0x1] %v9_v0 }
   0x3   :  { %11 = vsyncpa [#allocation6], 0  ;;  %s17_s19 = sshll.u32 %s2576_s0, 4  ;;  %s18_s19 = int_to_ptr.hbm [resolvable:$true] %s17_s19 }
   0x4   :  { %12 = vsyncpa [#allocation8], 0  ;;  %s1690_s20 = smov [#allocation5]   ;;  %s30_s24 = sshll.u32 %s2577_s1, 4  ;;  %s31_s24 = int_to_ptr.hbm [resolvable:$true] %s30_s24 }
   0x5   :  { %s19_s21 = sshll.u32 %s1690_s20, 4  ;;  %s1691_s25 = smov 512   ;;  %s20_s21 = int_to_ptr.vmem [resolvable:$true] %s19_s21 }
   0x6   :  { %s1692_s26 = smov 32   ;;  %s1693_s3 = smov [#allocation7]  }
   0x7   :  { %25 = dma.hbm_to_vmem [thread:$0]  %s18_s19, 4096, %s20_s21, [#allocation6], %s1691_s25, %s1691_s25, %s1692_s26  }
   0x8   :  { %s32_s27 = sshll.u32 %s1693_s3, 4  ;;  %s33_s27 = int_to_ptr.vmem [resolvable:$true] %s32_s27 }
   0x9   :  { %38 = dma.hbm_to_vmem [thread:$0]  %s31_s24, 8192, %s33_s27, [#allocation8], %s1691_s25, %s1691_s25, %s1692_s26  }
   0xa   :  { %1686 = dma.done.wait [#allocation6], 4096  }
   0xb   :  { %1687 = vsyncadd [#allocation6], 4294963200 }
   0xc   :  { %1688 = dma.done.wait [#allocation8], 8192  }
   0xd   :  { %1689 = vsyncadd [#allocation8], 4294959104  ;;  %v1729_v1 = vld [vmem:[#allocation7 + $0x1e0] sm:$0xff]  ;;  %v1731_v2 = vld [vmem:[#allocation7 + $0x1e8] sm:$0xff]  ;;  %v1694_v61 = vmov 0.0  }
   0xe   :  { %2687 = vst [vmem:[#allocation11_spill] sm:$0xff] %v1729_v1  ;;  %v1733_v3 = vld [vmem:[#allocation7 + $0x1f8] sm:$0xff]  ;;  %127 = vmatpush.msra.mxu0 %v1729_v1  ;;  %147 = vmatpush.msra.mxu1 %v1731_v2  ;;  %v1737_v4 = vld [vmem:[#allocation7 + $0x1c0] sm:$0xff]  ;;  %v1739_v5 = vld [vmem:[#allocation7 + $0x1c8] sm:$0xff] }
   0xf   :  { %v1741_v6 = vld [vmem:[#allocation7 + $0x1d8] sm:$0xff]  ;;  %187 = vmatpush.msra.mxu3 %v1733_v3  ;;  %v1744_v7 = vld [vmem:[#allocation7 + $0x1a0] sm:$0xff]  ;;  %v1746_v8 = vld [vmem:[#allocation7 + $0x1a8] sm:$0xff] }
  0x10   :  { %128 = vmatpush.msra.mxu0 %v1737_v4  ;;  %148 = vmatpush.msra.mxu1 %v1739_v5  ;;  %v1750_v9 = vld [vmem:[#allocation7 + $0x1b8] sm:$0xff]  ;;  %v1753_v10 = vld [vmem:[#allocation7 + $0x180] sm:$0xff]  ;;  %v1755_v11 = vld [vmem:[#allocation7 + $0x188] sm:$0xff] }
  0x11   :  { %188 = vmatpush.msra.mxu3 %v1741_v6  ;;  %v1759_v12 = vld [vmem:[#allocation7 + $0x198] sm:$0xff]  ;;  %v1762_v13 = vld [vmem:[#allocation7 + $0x160] sm:$0xff]  ;;  %v1764_v14 = vld [vmem:[#allocation7 + $0x168] sm:$0xff] }
  0x12   :  { %129 = vmatpush.msra.mxu0 %v1744_v7  ;;  %149 = vmatpush.msra.mxu1 %v1746_v8  ;;  %v1768_v15 = vld [vmem:[#allocation7 + $0x178] sm:$0xff]  ;;  %v1771_v16 = vld [vmem:[#allocation7 + $0x140] sm:$0xff]  ;;  %v1773_v17 = vld [vmem:[#allocation7 + $0x148] sm:$0xff] }
  0x13   :  { %189 = vmatpush.msra.mxu3 %v1750_v9  ;;  %v1775_v18 = vld [vmem:[#allocation7 + $0x1f0] sm:$0xff]  ;;  %v1779_v19 = vld [vmem:[#allocation7 + $0x158] sm:$0xff]  ;;  %v1784_v21 = vld [vmem:[#allocation7 + $0x120] sm:$0xff] }
  0x14   :  { %130 = vmatpush.msra.mxu0 %v1753_v10  ;;  %150 = vmatpush.msra.mxu1 %v1755_v11  ;;  %v1781_v20 = vld [vmem:[#allocation7 + $0x1d0] sm:$0xff]  ;;  %v1786_v22 = vld [vmem:[#allocation7 + $0x128] sm:$0xff]  ;;  %v1791_v23 = vld [vmem:[#allocation7 + $0x138] sm:$0xff] }
  0x15   :  { %190 = vmatpush.msra.mxu3 %v1759_v12  ;;  %167 = vmatpush.msra.mxu2 %v1775_v18  ;;  %v1793_v24 = vld [vmem:[#allocation7 + $0x1b0] sm:$0xff]  ;;  %v1796_v25 = vld [vmem:[#allocation7 + $0x100] sm:$0xff]  ;;  %v1798_v26 = vld [vmem:[#allocation7 + $0x108] sm:$0xff] }
  0x16   :  { %131 = vmatpush.msra.mxu0 %v1762_v13  ;;  %151 = vmatpush.msra.mxu1 %v1764_v14  ;;  %v1803_v27 = vld [vmem:[#allocation7 + $0x118] sm:$0xff]  ;;  %v1805_v28 = vld [vmem:[#allocation7 + $0x190] sm:$0xff]  ;;  %v1808_v29 = vld [vmem:[#allocation7 + $0xe0] sm:$0xff] }
  0x17   :  { %191 = vmatpush.msra.mxu3 %v1768_v15  ;;  %168 = vmatpush.msra.mxu2 %v1781_v20  ;;  %v1810_v30 = vld [vmem:[#allocation7 + $0xe8] sm:$0xff]  ;;  %v1815_v31 = vld [vmem:[#allocation7 + $0xf8] sm:$0xff]  ;;  %v1817_v32 = vld [vmem:[#allocation7 + $0x170] sm:$0xff] }
  0x18   :  { %132 = vmatpush.msra.mxu0 %v1771_v16  ;;  %152 = vmatpush.msra.mxu1 %v1773_v17  ;;  %v1820_v33 = vld [vmem:[#allocation7 + $0xc0] sm:$0xff]  ;;  %v1822_v34 = vld [vmem:[#allocation7 + $0xc8] sm:$0xff]  ;;  %v1827_v35 = vld [vmem:[#allocation7 + $0xd8] sm:$0xff] }
  0x19   :  { %192 = vmatpush.msra.mxu3 %v1779_v19  ;;  %169 = vmatpush.msra.mxu2 %v1793_v24  ;;  %2688 = vst [vmem:[#allocation12_spill] sm:$0xff] %v1827_v35  ;;  %v1829_v36 = vld [vmem:[#allocation7 + $0x150] sm:$0xff]  ;;  %v1832_v37 = vld [vmem:[#allocation7 + $0xa0] sm:$0xff]  ;;  %v1834_v38 = vld [vmem:[#allocation7 + $0xa8] sm:$0xff] }
  0x1a   :  { %133 = vmatpush.msra.mxu0 %v1784_v21  ;;  %153 = vmatpush.msra.mxu1 %v1786_v22  ;;  %2689 = vst [vmem:[#allocation13_spill] sm:$0xff] %v1832_v37  ;;  %v1839_v39 = vld [vmem:[#allocation7 + $0xb8] sm:$0xff]  ;;  %v1841_v40 = vld [vmem:[#allocation7 + $0x130] sm:$0xff]  ;;  %v1844_v41 = vld [vmem:[#allocation7 + $0x80] sm:$0xff] }
  0x1b   :  { %193 = vmatpush.msra.mxu3 %v1791_v23  ;;  %170 = vmatpush.msra.mxu2 %v1805_v28  ;;  %2690 = vst [vmem:[#allocation14_spill] sm:$0xff] %v1834_v38  ;;  %v1846_v42 = vld [vmem:[#allocation7 + $0x88] sm:$0xff]  ;;  %v1851_v43 = vld [vmem:[#allocation7 + $0x98] sm:$0xff]  ;;  %v1853_v44 = vld [vmem:[#allocation7 + $0x110] sm:$0xff] }
  0x1c   :  { %134 = vmatpush.msra.mxu0 %v1796_v25  ;;  %154 = vmatpush.msra.mxu1 %v1798_v26  ;;  %2691 = vst [vmem:[#allocation15_spill] sm:$0xff] %v1839_v39  ;;  %v1856_v45 = vld [vmem:[#allocation7 + $0x60] sm:$0xff]  ;;  %v1858_v46 = vld [vmem:[#allocation7 + $0x68] sm:$0xff]  ;;  %v1863_v47 = vld [vmem:[#allocation7 + $0x78] sm:$0xff] }
  0x1d   :  { %194 = vmatpush.msra.mxu3 %v1803_v27  ;;  %171 = vmatpush.msra.mxu2 %v1817_v32  ;;  %2692 = vst [vmem:[#allocation16_spill] sm:$0xff] %v1844_v41  ;;  %v1865_v48 = vld [vmem:[#allocation7 + $0xf0] sm:$0xff]  ;;  %v1868_v49 = vld [vmem:[#allocation7 + $0x40] sm:$0xff]  ;;  %v1870_v50 = vld [vmem:[#allocation7 + $0x48] sm:$0xff] }
  0x1e   :  { %135 = vmatpush.msra.mxu0 %v1808_v29  ;;  %155 = vmatpush.msra.mxu1 %v1810_v30  ;;  %2693 = vst [vmem:[#allocation17_spill] sm:$0xff] %v1846_v42  ;;  %v1875_v51 = vld [vmem:[#allocation7 + $0x58] sm:$0xff]  ;;  %v1877_v52 = vld [vmem:[#allocation7 + $0xd0] sm:$0xff]  ;;  %v1880_v53 = vld [vmem:[#allocation7 + $0x20] sm:$0xff] }
  0x1f   :  { %195 = vmatpush.msra.mxu3 %v1815_v31  ;;  %172 = vmatpush.msra.mxu2 %v1829_v36  ;;  %2694 = vst [vmem:[#allocation18_spill] sm:$0xff] %v1851_v43  ;;  %v1882_v54 = vld [vmem:[#allocation7 + $0x28] sm:$0xff]  ;;  %v1887_v55 = vld [vmem:[#allocation7 + $0x38] sm:$0xff]  ;;  %v1889_v56 = vld [vmem:[#allocation7 + $0xb0] sm:$0xff] }
  0x20   :  { %136 = vmatpush.msra.mxu0 %v1820_v33  ;;  %156 = vmatpush.msra.mxu1 %v1822_v34  ;;  %2695 = vst [vmem:[#allocation19_spill] sm:$0xff] %v1856_v45  ;;  %v1892_v57 = vld [vmem:[#allocation7] sm:$0xff]  ;;  %v1894_v58 = vld [vmem:[#allocation7 + $0x8] sm:$0xff]  ;;  %v1899_v59 = vld [vmem:[#allocation7 + $0x18] sm:$0xff] }
  0x21   :  { %196 = vmatpush.msra.mxu3 %v1827_v35  ;;  %2696 = vst [vmem:[#allocation20_spill] sm:$0xff] %v1858_v46  ;;  %173 = vmatpush.msra.mxu2 %v1841_v40  ;;  %v1905_v60 = vld [vmem:[#allocation7 + $0x90] sm:$0xff] }
  0x22   :  { %137 = vmatpush.msra.mxu0 %v1832_v37  ;;  %157 = vmatpush.msra.mxu1 %v1834_v38  ;;  %2697 = vst [vmem:[#allocation21_spill] sm:$0xff] %v1863_v47  ;;  %v1908_v62 = vld [vmem:[#allocation7 + $0x70] sm:$0xff] }
  0x23   :  { %197 = vmatpush.msra.mxu3 %v1839_v39  ;;  %2698 = vst [vmem:[#allocation22_spill] sm:$0xff] %v1868_v49  ;;  %174 = vmatpush.msra.mxu2 %v1853_v44  ;;  %v1912_v63 = vld [vmem:[#allocation7 + $0x50] sm:$0xff] }
  0x24   :  { %138 = vmatpush.msra.mxu0 %v1844_v41  ;;  %158 = vmatpush.msra.mxu1 %v1846_v42  ;;  %2699 = vst [vmem:[#allocation23_spill] sm:$0xff] %v1870_v50  ;;  %v1918_v0 = vld [vmem:[#allocation7 + $0x30] sm:$0xff] }
  0x25   :  { %198 = vmatpush.msra.mxu3 %v1851_v43  ;;  %2700 = vst [vmem:[#allocation24_spill] sm:$0xff] %v1875_v51  ;;  %175 = vmatpush.msra.mxu2 %v1865_v48 }
  0x26   :  { %139 = vmatpush.msra.mxu0 %v1856_v45  ;;  %159 = vmatpush.msra.mxu1 %v1858_v46  ;;  %2701 = vst [vmem:[#allocation25_spill] sm:$0xff] %v1877_v52 }
  0x27   :  { %199 = vmatpush.msra.mxu3 %v1863_v47  ;;  %2702 = vst [vmem:[#allocation26_spill] sm:$0xff] %v1880_v53  ;;  %176 = vmatpush.msra.mxu2 %v1877_v52 }
  0x28   :  { %2703 = vst [vmem:[#allocation27_spill] sm:$0xff] %v1882_v54  ;;  %140 = vmatpush.msra.mxu0 %v1868_v49  ;;  %160 = vmatpush.msra.mxu1 %v1870_v50 }
  0x29   :  { %2704 = vst [vmem:[#allocation28_spill] sm:$0xff] %v1887_v55  ;;  %200 = vmatpush.msra.mxu3 %v1875_v51  ;;  %177 = vmatpush.msra.mxu2 %v1889_v56 }
  0x2a   :  { %2705 = vst [vmem:[#allocation29_spill] sm:$0xff] %v1889_v56  ;;  %141 = vmatpush.msra.mxu0 %v1880_v53  ;;  %161 = vmatpush.msra.mxu1 %v1882_v54 }
  0x2b   :  { %2706 = vst [vmem:[#allocation30_spill] sm:$0xff] %v1892_v57  ;;  %201 = vmatpush.msra.mxu3 %v1887_v55  ;;  %178 = vmatpush.msra.mxu2 %v1905_v60 }
  0x2c   :  { %2707 = vst [vmem:[#allocation31_spill] sm:$0xff] %v1894_v58  ;;  %142 = vmatpush.msra.mxu0 %v1892_v57  ;;  %162 = vmatpush.msra.mxu1 %v1894_v58 }
  0x2d   :  { %2708 = vst [vmem:[#allocation32_spill] sm:$0xff] %v1899_v59  ;;  %202 = vmatpush.msra.mxu3 %v1899_v59  ;;  %143 = vmatmul.f32.vlgmr.msra.gmra.mxu0 %v1694_v61 }
  0x2e   :  { %2709 = vst [vmem:[#allocation33_spill] sm:$0xff] %v1905_v60  ;;  %163 = vmatmul.f32.vlgmr.msra.gmra.mxu1 %v1694_v61  ;;  %203 = vmatmul.f32.vlgmr.msra.gmra.mxu3 %v1694_v61 }
  0x2f   :  { %2710 = vst [vmem:[#allocation34_spill] sm:$0xff] %v1908_v62  ;;  %279 = vmatpush.msrb.mxu0 %v1729_v1  ;;  %299 = vmatpush.msrb.mxu1 %v1731_v2  ;;  %v1924_v1 = vld [vmem:[#allocation7 + $0x10] sm:$0xff] }
  0x30   :  { %2711 = vst [vmem:[#allocation35_spill] sm:$0xff] %v1912_v63  ;;  %339 = vmatpush.msrb.mxu3 %v1733_v3  ;;  %179 = vmatpush.msra.mxu2 %v1908_v62 }
  0x31   :  { %280 = vmatpush.msrb.mxu0 %v1737_v4  ;;  %2712 = vst [vmem:[#allocation36_spill] sm:$0xff] %v1918_v0  ;;  %300 = vmatpush.msrb.mxu1 %v1739_v5 }
  0x32   :  { %340 = vmatpush.msrb.mxu3 %v1741_v6  ;;  %180 = vmatpush.msra.mxu2 %v1912_v63  ;;  %2713 = vst [vmem:[#allocation37_spill] sm:$0xff] %v1924_v1 }
  0x33   :  { %281 = vmatpush.msrb.mxu0 %v1744_v7  ;;  %301 = vmatpush.msrb.mxu1 %v1746_v8 }
  0x34   :  { %341 = vmatpush.msrb.mxu3 %v1750_v9  ;;  %181 = vmatpush.msra.mxu2 %v1918_v0 }
  0x35   :  { %282 = vmatpush.msrb.mxu0 %v1753_v10  ;;  %302 = vmatpush.msrb.mxu1 %v1755_v11 }
  0x36   :  { %342 = vmatpush.msrb.mxu3 %v1759_v12  ;;  %182 = vmatpush.msra.mxu2 %v1924_v1 }
  0x37   :  { %283 = vmatpush.msrb.mxu0 %v1762_v13  ;;  %183 = vmatmul.f32.vlgmr.msra.gmra.mxu2 %v1694_v61  ;;  %v2714_v61 = vld [vmem:[#allocation11_spill] sm:$0xff] }
  0x38   :  { %303 = vmatpush.msrb.mxu1 %v1764_v14  ;;  %319 = vmatpush.msrb.mxu2 %v1775_v18 }
  0x39   :  { %343 = vmatpush.msrb.mxu3 %v1768_v15  ;;  %284 = vmatpush.msrb.mxu0 %v1771_v16 }
  0x3a   :  { %304 = vmatpush.msrb.mxu1 %v1773_v17  ;;  %320 = vmatpush.msrb.mxu2 %v1781_v20 }
  0x3b   :  { %344 = vmatpush.msrb.mxu3 %v1779_v19  ;;  %285 = vmatpush.msrb.mxu0 %v1784_v21 }
  0x3c   :  { %305 = vmatpush.msrb.mxu1 %v1786_v22  ;;  %321 = vmatpush.msrb.mxu2 %v1793_v24 }
  0x3d   :  { %345 = vmatpush.msrb.mxu3 %v1791_v23  ;;  %286 = vmatpush.msrb.mxu0 %v1796_v25 }
  0x3e   :  { %306 = vmatpush.msrb.mxu1 %v1798_v26  ;;  %322 = vmatpush.msrb.mxu2 %v1805_v28 }
  0x3f   :  { %346 = vmatpush.msrb.mxu3 %v1803_v27  ;;  %287 = vmatpush.msrb.mxu0 %v1808_v29 }
  0x40   :  { %307 = vmatpush.msrb.mxu1 %v1810_v30  ;;  %323 = vmatpush.msrb.mxu2 %v1817_v32 }
  0x41   :  { %347 = vmatpush.msrb.mxu3 %v1815_v31  ;;  %288 = vmatpush.msrb.mxu0 %v1820_v33 }
  0x42   :  { %308 = vmatpush.msrb.mxu1 %v1822_v34  ;;  %324 = vmatpush.msrb.mxu2 %v1829_v36 }
  0x43   :  { %348 = vmatpush.msrb.mxu3 %v1827_v35  ;;  %289 = vmatpush.msrb.mxu0 %v1832_v37 }
  0x44   :  { %309 = vmatpush.msrb.mxu1 %v1834_v38  ;;  %325 = vmatpush.msrb.mxu2 %v1841_v40 }
  0x45   :  { %349 = vmatpush.msrb.mxu3 %v1839_v39  ;;  %290 = vmatpush.msrb.mxu0 %v1844_v41 }
  0x46   :  { %310 = vmatpush.msrb.mxu1 %v1846_v42  ;;  %326 = vmatpush.msrb.mxu2 %v1853_v44 }
  0x47   :  { %350 = vmatpush.msrb.mxu3 %v1851_v43  ;;  %291 = vmatpush.msrb.mxu0 %v1856_v45 }
  0x48   :  { %311 = vmatpush.msrb.mxu1 %v1858_v46  ;;  %327 = vmatpush.msrb.mxu2 %v1865_v48 }
  0x49   :  { %351 = vmatpush.msrb.mxu3 %v1863_v47  ;;  %292 = vmatpush.msrb.mxu0 %v1868_v49 }
  0x4a   :  { %312 = vmatpush.msrb.mxu1 %v1870_v50  ;;  %328 = vmatpush.msrb.mxu2 %v1877_v52 }
  0x4b   :  { %352 = vmatpush.msrb.mxu3 %v1875_v51  ;;  %293 = vmatpush.msrb.mxu0 %v1880_v53 }
  0x4c   :  { %313 = vmatpush.msrb.mxu1 %v1882_v54  ;;  %329 = vmatpush.msrb.mxu2 %v1889_v56 }
  0x4d   :  { %353 = vmatpush.msrb.mxu3 %v1887_v55  ;;  %294 = vmatpush.msrb.mxu0 %v1892_v57 }
  0x4e   :  { %314 = vmatpush.msrb.mxu1 %v1894_v58  ;;  %330 = vmatpush.msrb.mxu2 %v1905_v60 }
  0x4f   :  { %354 = vmatpush.msrb.mxu3 %v1899_v59  ;;  %431 = vmatpush.msra.mxu0 %v2714_v61 }
  0x50   :  { %451 = vmatpush.msra.mxu1 %v1731_v2  ;;  %331 = vmatpush.msrb.mxu2 %v1908_v62 }
  0x51   :  { %491 = vmatpush.msra.mxu3 %v1733_v3  ;;  %432 = vmatpush.msra.mxu0 %v1737_v4 }
  0x52   :  { %452 = vmatpush.msra.mxu1 %v1739_v5  ;;  %332 = vmatpush.msrb.mxu2 %v1912_v63 }
  0x53   :  { %492 = vmatpush.msra.mxu3 %v1741_v6  ;;  %433 = vmatpush.msra.mxu0 %v1744_v7 }
  0x54   :  { %453 = vmatpush.msra.mxu1 %v1746_v8  ;;  %333 = vmatpush.msrb.mxu2 %v1918_v0 }
  0x55   :  { %493 = vmatpush.msra.mxu3 %v1750_v9  ;;  %434 = vmatpush.msra.mxu0 %v1753_v10 }
  0x56   :  { %454 = vmatpush.msra.mxu1 %v1755_v11  ;;  %334 = vmatpush.msrb.mxu2 %v1924_v1 }
  0x57   :  { %494 = vmatpush.msra.mxu3 %v1759_v12  ;;  %435 = vmatpush.msra.mxu0 %v1762_v13 }
  0x58   :  { %471 = vmatpush.msra.mxu2 %v1775_v18  ;;  %455 = vmatpush.msra.mxu1 %v1764_v14 }
  0x59   :  { %495 = vmatpush.msra.mxu3 %v1768_v15  ;;  %436 = vmatpush.msra.mxu0 %v1771_v16 }
  0x5a   :  { %472 = vmatpush.msra.mxu2 %v1781_v20  ;;  %456 = vmatpush.msra.mxu1 %v1773_v17 }
  0x5b   :  { %496 = vmatpush.msra.mxu3 %v1779_v19  ;;  %437 = vmatpush.msra.mxu0 %v1784_v21 }
  0x5c   :  { %473 = vmatpush.msra.mxu2 %v1793_v24  ;;  %457 = vmatpush.msra.mxu1 %v1786_v22 }
  0x5d   :  { %497 = vmatpush.msra.mxu3 %v1791_v23  ;;  %438 = vmatpush.msra.mxu0 %v1796_v25 }
  0x5e   :  { %474 = vmatpush.msra.mxu2 %v1805_v28  ;;  %458 = vmatpush.msra.mxu1 %v1798_v26 }
  0x5f   :  { %498 = vmatpush.msra.mxu3 %v1803_v27  ;;  %439 = vmatpush.msra.mxu0 %v1808_v29 }
  0x60   :  { %475 = vmatpush.msra.mxu2 %v1817_v32  ;;  %459 = vmatpush.msra.mxu1 %v1810_v30 }
  0x61   :  { %499 = vmatpush.msra.mxu3 %v1815_v31  ;;  %440 = vmatpush.msra.mxu0 %v1820_v33 }
  0x62   :  { %476 = vmatpush.msra.mxu2 %v1829_v36  ;;  %460 = vmatpush.msra.mxu1 %v1822_v34 }
  0x63   :  { %500 = vmatpush.msra.mxu3 %v1827_v35  ;;  %441 = vmatpush.msra.mxu0 %v1832_v37 }
  0x64   :  { %477 = vmatpush.msra.mxu2 %v1841_v40  ;;  %461 = vmatpush.msra.mxu1 %v1834_v38 }
  0x65   :  { %501 = vmatpush.msra.mxu3 %v1839_v39  ;;  %442 = vmatpush.msra.mxu0 %v1844_v41 }
  0x66   :  { %478 = vmatpush.msra.mxu2 %v1853_v44  ;;  %462 = vmatpush.msra.mxu1 %v1846_v42 }
  0x67   :  { %502 = vmatpush.msra.mxu3 %v1851_v43  ;;  %443 = vmatpush.msra.mxu0 %v1856_v45 }
  0x68   :  { %479 = vmatpush.msra.mxu2 %v1865_v48  ;;  %463 = vmatpush.msra.mxu1 %v1858_v46 }
  0x69   :  { %503 = vmatpush.msra.mxu3 %v1863_v47  ;;  %444 = vmatpush.msra.mxu0 %v1868_v49 }
  0x6a   :  { %480 = vmatpush.msra.mxu2 %v1877_v52  ;;  %464 = vmatpush.msra.mxu1 %v1870_v50 }
  0x6b   :  { %504 = vmatpush.msra.mxu3 %v1875_v51  ;;  %445 = vmatpush.msra.mxu0 %v1880_v53  ;;  %v123_v53 = vld [vmem:[#allocation5] sm:$0xff] }
  0x6c   :  { %481 = vmatpush.msra.mxu2 %v1889_v56  ;;  %465 = vmatpush.msra.mxu1 %v1882_v54  ;;  %v124_v54 = vld [vmem:[#allocation5 + $0x8] sm:$0xff] }
  0x6d   :  { %505 = vmatpush.msra.mxu3 %v1887_v55  ;;  %446 = vmatpush.msra.mxu0 %v1892_v57 }
  0x6e   :  { %482 = vmatpush.msra.mxu2 %v1905_v60  ;;  %466 = vmatpush.msra.mxu1 %v1894_v58  ;;  %v126_v58 = vld [vmem:[#allocation5 + $0x18] sm:$0xff] }
  0x6f   :  { %506 = vmatpush.msra.mxu3 %v1899_v59 }
  0x70   :  { %483 = vmatpush.msra.mxu2 %v1908_v62 }
  0x72   :  { %484 = vmatpush.msra.mxu2 %v1912_v63 }
  0x74   :  { %485 = vmatpush.msra.mxu2 %v1918_v0 }
  0x76   :  { %486 = vmatpush.msra.mxu2 %v1924_v1  ;;  %v125_v1 = vld [vmem:[#allocation5 + $0x10] sm:$0xff] }
  0xaa   :  { %v144_v51 = vpop.f32.mrf.mxu0 }
  0xab   :  { %v207_v55 = vadd.f32 %v144_v51, %v123_v53  ;;  %v164_v50 = vpop.f32.mrf.mxu1 }
  0xac   :  { %v208_v49 = vadd.f32 %v164_v50, %v124_v54 }
  0xad   :  { %v1411_v47 = vmul.f32 -1.442695, %v207_v55 }
  0xae   :  { %v1412_v57 = vmul.f32 -1.442695, %v208_v49 }
  0xaf   :  { %1442 = vpow2.f32 %v1411_v47 }
  0xb0   :  { %1444 = vpow2.f32 %v1412_v57 }
  0xb1   :  { %v204_v59 = vpop.f32.mrf.mxu3 }
  0xb2   :  { %v210_v46 = vadd.f32 %v204_v59, %v126_v58 }
  0xb4   :  { %v1413_v62 = vmul.f32 -1.442695, %v210_v46 }
  0xb5   :  { %v1443_v45 = vpop.eup %1442 }
  0xb6   :  { %v1445_v63 = vpop.eup %1444  ;;  %v214_v43 = vadd.f32 1.0, %v1443_v45  ;;  %1446 = vpow2.f32 %v1413_v62 }
  0xb7   :  { %v233_v0 = vadd.f32 1.0, %v1445_v63 }
  0xb8   :  { %1448 = vrcp.f32 %v214_v43  ;;  %v226_v58 = vand.u32 2147483648, %v214_v43  ;;  %v224_v62 = vand.u32 2147483647, %v214_v43  ;;  %vm220_vm2 = vweird.f32 %v214_v43 }
  0xb9   :  { %1450 = vrcp.f32 %v233_v0  ;;  %v245_v59 = vand.u32 2147483648, %v233_v0  ;;  %v243_v42 = vand.u32 2147483647, %v233_v0  ;;  %vm239_vm3 = vweird.f32 %v233_v0 }
  0xba   :  { %v184_v60 = vpop.f32.mrf.mxu2  ;;  %vm225_vm5 = vcmp.eq.f32.partialorder %v224_v62, 8.507059e+37  ;;  %v2722_v62 = vld [vmem:[#allocation17_spill] sm:$0xff] }
  0xbb   :  { %v209_v53 = vadd.f32 %v184_v60, %v125_v1  ;;  %vm244_vm7 = vcmp.eq.f32.partialorder %v243_v42, 8.507059e+37 }
  0xbc   :  { %v1447_v51 = vpop.eup %1446 }
  0xbd   :  { %v253_v50 = vadd.f32 1.0, %v1447_v51  ;;  %v227_v51 = vor.u32 1.1754944e-38, %v226_v58 }
  0xbe   :  { %v1449_v54 = vpop.eup %1448 }
  0xbf   :  { %v1451_v49 = vpop.eup %1450  ;;  %v216_v47 = vmul.f32 %v1449_v54, %v214_v43  ;;  %1452 = vrcp.f32 %v253_v50  ;;  %vm221_vm0 = vweird.f32 %v1449_v54  ;;  %vm259_vm9 = vweird.f32 %v253_v50 }
  0xc0   :  { %v235_v55 = vmul.f32 %v1451_v49, %v233_v0  ;;  %1454 = vtanh.f32 %v209_v53  ;;  %vm240_vm1 = vweird.f32 %v1451_v49  ;;  %vm222_vm4 = vmor %vm220_vm2, %vm221_vm0  ;;  %v246_v53 = vor.u32 1.1754944e-38, %v245_v59 }
  0xc1   :  { %v217_v57 = vsub.f32 1.0, %v216_v47  ;;  %vm241_vm6 = vmor %vm239_vm3, %vm240_vm1  ;;  %v265_v0 = vand.u32 2147483648, %v253_v50  ;;  %v263_v58 = vand.u32 2147483647, %v253_v50 }
  0xc2   :  { %v236_v46 = vsub.f32 1.0, %v235_v55 }
  0xc3   :  { %v218_v45 = vmul.f32 %v1449_v54, %v217_v57  ;;  %vm264_vm11 = vcmp.eq.f32.partialorder %v263_v58, 8.507059e+37  ;;  %v2734_v58 = vld [vmem:[#allocation27_spill] sm:$0xff] }
  0xc4   :  { %v237_v63 = vmul.f32 %v1451_v49, %v236_v46 }
  0xc5   :  { %v1453_v41 = vpop.eup %1452  ;;  %v219_v39 = vadd.f32 %v1449_v54, %v218_v45 }
  0xc6   :  { %v1455_v1 = vpop.eup %1454  ;;  %v255_v60 = vmul.f32 %v1453_v41, %v253_v50  ;;  %v238_v56 = vadd.f32 %v1451_v49, %v237_v63  ;;  %vm260_vm8 = vweird.f32 %v1453_v41  ;;  %v2720_v50 = vld [vmem:[#allocation15_spill] sm:$0xff]  ;;  %v2723_v63 = vld [vmem:[#allocation33_spill] sm:$0xff] }
  0xc7   :  { %v223_v47 = vsel %vm222_vm4, %v1449_v54, %v219_v39  ;;  %vm261_vm10 = vmor %vm259_vm9, %vm260_vm8  ;;  %v266_v54 = vor.u32 1.1754944e-38, %v265_v0  ;;  %v2733_v0 = vld [vmem:[#allocation26_spill] sm:$0xff] }
  0xc8   :  { %v256_v55 = vsub.f32 1.0, %v255_v60  ;;  %v228_v57 = vsel %vm225_vm5, %v227_v51, %v223_v47  ;;  %v242_v38 = vsel %vm241_vm6, %v1451_v49, %v238_v56  ;;  %v2721_v49 = vld [vmem:[#allocation16_spill] sm:$0xff]  ;;  %v2725_v60 = vld [vmem:[#allocation19_spill] sm:$0xff]  ;;  %v2728_v47 = vld [vmem:[#allocation21_spill] sm:$0xff] }
  0xc9   :  { %v247_v46 = vsel %vm244_vm7, %v246_v53, %v242_v38  ;;  %v270_v37 = vmul.f32 %v1455_v1, %v228_v57  ;;  %v2717_v38 = vld [vmem:[#allocation13_spill] sm:$0xff]  ;;  %v2724_v1 = vld [vmem:[#allocation18_spill] sm:$0xff]  ;;  %v2726_v51 = vld [vmem:[#allocation20_spill] sm:$0xff] }
  0xca   :  { %v269_v35 = vmul.f32 0.0, %v247_v46  ;;  %v257_v52 = vmul.f32 %v1453_v41, %v256_v55  ;;  %v2727_v53 = vld [vmem:[#allocation34_spill] sm:$0xff]  ;;  %v2730_v57 = vld [vmem:[#allocation23_spill] sm:$0xff] }
  0xcb   :  { %v2729_v55 = vld [vmem:[#allocation22_spill] sm:$0xff]  ;;  %v2731_v46 = vld [vmem:[#allocation35_spill] sm:$0xff] }
  0xcc   :  { %v2049_v45 = vadd.f32 %v270_v37, %v269_v35  ;;  %v258_v43 = vadd.f32 %v1453_v41, %v257_v52  ;;  %v2715_v35 = vld [vmem:[#allocation25_spill] sm:$0xff]  ;;  %v2716_v37 = vld [vmem:[#allocation12_spill] sm:$0xff] }
  0xcd   :  { %v2719_v52 = vld [vmem:[#allocation29_spill] sm:$0xff] }
  0xce   :  { %1456 = vtanh.f32 %v2049_v45  ;;  %v262_v39 = vsel %vm261_vm10, %v1453_v41, %v258_v43  ;;  %v2718_v41 = vld [vmem:[#allocation14_spill] sm:$0xff]  ;;  %v2732_v43 = vld [vmem:[#allocation24_spill] sm:$0xff] }
  0xcf   :  { %v267_v56 = vsel %vm264_vm11, %v266_v54, %v262_v39  ;;  %v2735_v39 = vld [vmem:[#allocation36_spill] sm:$0xff] }
  0xd0   :  { %v2736_v54 = vld [vmem:[#allocation28_spill] sm:$0xff] }
  0xd4   :  { %v1457_v59 = vpop.eup %1456 }
  0xd5   :  { %v273_v42 = vmul.f32 %v1457_v59, %v267_v56  ;;  %v2737_v59 = vld [vmem:[#allocation30_spill] sm:$0xff]  ;;  %v2738_v56 = vld [vmem:[#allocation31_spill] sm:$0xff] }
  0xd7   :  { %295 = vmatmul.f32.vlgmr.msrb.gmra.mxu0 %v273_v42  ;;  %315 = vmatmul.f32.vlgmr.msrb.gmra.mxu1 %v273_v42 }
  0xd8   :  { %335 = vmatmul.f32.vlgmr.msrb.gmra.mxu2 %v273_v42  ;;  %355 = vmatmul.f32.vlgmr.msrb.gmra.mxu3 %v273_v42  ;;  %v2739_v42 = vld [vmem:[#allocation37_spill] sm:$0xff] }
  0xd9   :  { %583 = vmatpush.msrb.mxu0 %v2714_v61  ;;  %603 = vmatpush.msrb.mxu1 %v1731_v2 }
  0xda   :  { %623 = vmatpush.msrb.mxu2 %v1775_v18  ;;  %643 = vmatpush.msrb.mxu3 %v1733_v3 }
  0xdb   :  { %584 = vmatpush.msrb.mxu0 %v1737_v4  ;;  %604 = vmatpush.msrb.mxu1 %v1739_v5 }
  0xdc   :  { %624 = vmatpush.msrb.mxu2 %v1781_v20  ;;  %644 = vmatpush.msrb.mxu3 %v1741_v6 }
  0xdd   :  { %585 = vmatpush.msrb.mxu0 %v1744_v7  ;;  %605 = vmatpush.msrb.mxu1 %v1746_v8 }
  0xde   :  { %625 = vmatpush.msrb.mxu2 %v1793_v24  ;;  %645 = vmatpush.msrb.mxu3 %v1750_v9 }
  0xdf   :  { %586 = vmatpush.msrb.mxu0 %v1753_v10  ;;  %606 = vmatpush.msrb.mxu1 %v1755_v11 }
  0xe0   :  { %626 = vmatpush.msrb.mxu2 %v1805_v28  ;;  %646 = vmatpush.msrb.mxu3 %v1759_v12 }
  0xe1   :  { %587 = vmatpush.msrb.mxu0 %v1762_v13  ;;  %607 = vmatpush.msrb.mxu1 %v1764_v14 }
  0xe2   :  { %627 = vmatpush.msrb.mxu2 %v1817_v32  ;;  %647 = vmatpush.msrb.mxu3 %v1768_v15 }
  0xe3   :  { %588 = vmatpush.msrb.mxu0 %v1771_v16  ;;  %608 = vmatpush.msrb.mxu1 %v1773_v17 }
  0xe4   :  { %628 = vmatpush.msrb.mxu2 %v1829_v36  ;;  %648 = vmatpush.msrb.mxu3 %v1779_v19 }
  0xe5   :  { %589 = vmatpush.msrb.mxu0 %v1784_v21  ;;  %609 = vmatpush.msrb.mxu1 %v1786_v22 }
  0xe6   :  { %629 = vmatpush.msrb.mxu2 %v1841_v40  ;;  %649 = vmatpush.msrb.mxu3 %v1791_v23 }
  0xe7   :  { %590 = vmatpush.msrb.mxu0 %v1796_v25  ;;  %610 = vmatpush.msrb.mxu1 %v1798_v26 }
  0xe8   :  { %630 = vmatpush.msrb.mxu2 %v1853_v44  ;;  %650 = vmatpush.msrb.mxu3 %v1803_v27 }
  0xe9   :  { %591 = vmatpush.msrb.mxu0 %v1808_v29  ;;  %611 = vmatpush.msrb.mxu1 %v1810_v30 }
  0xea   :  { %631 = vmatpush.msrb.mxu2 %v1865_v48  ;;  %651 = vmatpush.msrb.mxu3 %v1815_v31 }
  0xeb   :  { %592 = vmatpush.msrb.mxu0 %v1820_v33  ;;  %612 = vmatpush.msrb.mxu1 %v1822_v34 }
  0xec   :  { %632 = vmatpush.msrb.mxu2 %v2715_v35  ;;  %652 = vmatpush.msrb.mxu3 %v2716_v37 }
  0xed   :  { %593 = vmatpush.msrb.mxu0 %v2717_v38  ;;  %613 = vmatpush.msrb.mxu1 %v2718_v41 }
  0xee   :  { %633 = vmatpush.msrb.mxu2 %v2719_v52  ;;  %653 = vmatpush.msrb.mxu3 %v2720_v50 }
  0xef   :  { %594 = vmatpush.msrb.mxu0 %v2721_v49  ;;  %614 = vmatpush.msrb.mxu1 %v2722_v62 }
  0xf0   :  { %634 = vmatpush.msrb.mxu2 %v2723_v63  ;;  %654 = vmatpush.msrb.mxu3 %v2724_v1 }
  0xf1   :  { %595 = vmatpush.msrb.mxu0 %v2725_v60  ;;  %615 = vmatpush.msrb.mxu1 %v2726_v51 }
  0xf2   :  { %635 = vmatpush.msrb.mxu2 %v2727_v53  ;;  %655 = vmatpush.msrb.mxu3 %v2728_v47 }
  0xf3   :  { %596 = vmatpush.msrb.mxu0 %v2729_v55  ;;  %616 = vmatpush.msrb.mxu1 %v2730_v57  ;;  %v2740_v55 = vld [vmem:[#allocation32_spill] sm:$0xff]  ;;  %v275_v57 = vld [vmem:[#allocation5 + $0x20] sm:$0xff] }
  0xf4   :  { %636 = vmatpush.msrb.mxu2 %v2731_v46  ;;  %656 = vmatpush.msrb.mxu3 %v2732_v43  ;;  %v276_v46 = vld [vmem:[#allocation5 + $0x28] sm:$0xff] }
  0xf5   :  { %597 = vmatpush.msrb.mxu0 %v2733_v0  ;;  %617 = vmatpush.msrb.mxu1 %v2734_v58 }
  0xf6   :  { %637 = vmatpush.msrb.mxu2 %v2735_v39  ;;  %657 = vmatpush.msrb.mxu3 %v2736_v54  ;;  %v278_v39 = vld [vmem:[#allocation5 + $0x38] sm:$0xff] }
  0xf7   :  { %598 = vmatpush.msrb.mxu0 %v2737_v59  ;;  %618 = vmatpush.msrb.mxu1 %v2738_v56 }
  0xf8   :  { %638 = vmatpush.msrb.mxu2 %v2739_v42  ;;  %658 = vmatpush.msrb.mxu3 %v2740_v55  ;;  %v277_v55 = vld [vmem:[#allocation5 + $0x30] sm:$0xff] }
 0x154   :  { %v296_v47 = vpop.f32.mrf.mxu0  ;;  %v316_v43 = vpop.f32.mrf.mxu1 }
 0x155   :  { %v359_v53 = vadd.f32 %v296_v47, %v275_v57  ;;  %v360_v0 = vadd.f32 %v316_v43, %v276_v46 }
 0x157   :  { %v1414_v51 = vmul.f32 -1.442695, %v359_v53  ;;  %v1415_v58 = vmul.f32 -1.442695, %v360_v0 }
 0x159   :  { %1458 = vpow2.f32 %v1414_v51 }
 0x15a   :  { %1460 = vpow2.f32 %v1415_v58 }
 0x15b   :  { %v356_v54 = vpop.f32.mrf.mxu3  ;;  %v336_v62 = vpop.f32.mrf.mxu2 }
 0x15c   :  { %v362_v60 = vadd.f32 %v356_v54, %v278_v39  ;;  %v361_v53 = vadd.f32 %v336_v62, %v277_v55 }
 0x15e   :  { %v1416_v59 = vmul.f32 -1.442695, %v362_v60 }
 0x15f   :  { %v1459_v1 = vpop.eup %1458 }
 0x160   :  { %v1461_v56 = vpop.eup %1460  ;;  %v366_v63 = vadd.f32 1.0, %v1459_v1  ;;  %1462 = vpow2.f32 %v1416_v59 }
 0x161   :  { %v385_v42 = vadd.f32 1.0, %v1461_v56 }
 0x162   :  { %1464 = vrcp.f32 %v366_v63  ;;  %v378_v60 = vand.u32 2147483648, %v366_v63  ;;  %v376_v54 = vand.u32 2147483647, %v366_v63  ;;  %vm372_vm14 = vweird.f32 %v366_v63 }
 0x163   :  { %1466 = vrcp.f32 %v385_v42  ;;  %v397_v39 = vand.u32 2147483648, %v385_v42  ;;  %v395_v56 = vand.u32 2147483647, %v385_v42  ;;  %vm391_vm15 = vweird.f32 %v385_v42 }
 0x164   :  { %vm377_vm2 = vcmp.eq.f32.partialorder %v376_v54, 8.507059e+37 }
 0x165   :  { %vm396_vm3 = vcmp.eq.f32.partialorder %v395_v56, 8.507059e+37 }
 0x166   :  { %v1463_v49 = vpop.eup %1462 }
 0x167   :  { %v405_v47 = vadd.f32 1.0, %v1463_v49  ;;  %v379_v49 = vor.u32 1.1754944e-38, %v378_v60 }
 0x168   :  { %v1465_v57 = vpop.eup %1464 }
 0x169   :  { %v1467_v46 = vpop.eup %1466  ;;  %v368_v51 = vmul.f32 %v1465_v57, %v366_v63  ;;  %1468 = vrcp.f32 %v405_v47  ;;  %vm373_vm12 = vweird.f32 %v1465_v57  ;;  %v417_v60 = vand.u32 2147483648, %v405_v47 }
 0x16a   :  { %v387_v43 = vmul.f32 %v1467_v46, %v385_v42  ;;  %1470 = vtanh.f32 %v361_v53  ;;  %vm392_vm13 = vweird.f32 %v1467_v46  ;;  %vm374_vm0 = vmor %vm372_vm14, %vm373_vm12  ;;  %vm411_vm5 = vweird.f32 %v405_v47 }
 0x16b   :  { %v369_v0 = vsub.f32 1.0, %v368_v51  ;;  %vm393_vm1 = vmor %vm391_vm15, %vm392_vm13  ;;  %v398_v51 = vor.u32 1.1754944e-38, %v397_v39  ;;  %v418_v39 = vor.u32 1.1754944e-38, %v417_v60 }
 0x16c   :  { %v388_v58 = vsub.f32 1.0, %v387_v43 }
 0x16d   :  { %v370_v1 = vmul.f32 %v1465_v57, %v369_v0 }
 0x16e   :  { %v389_v59 = vmul.f32 %v1467_v46, %v388_v58 }
 0x16f   :  { %v1469_v50 = vpop.eup %1468  ;;  %v371_v52 = vadd.f32 %v1465_v57, %v370_v1 }
 0x170   :  { %v390_v62 = vadd.f32 %v1467_v46, %v389_v59  ;;  %v407_v55 = vmul.f32 %v1469_v50, %v405_v47  ;;  %v1471_v53 = vpop.eup %1470  ;;  %vm412_vm4 = vweird.f32 %v1469_v50 }
 0x171   :  { %v375_v43 = vsel %vm374_vm0, %v1465_v57, %v371_v52  ;;  %v415_v52 = vand.u32 2147483647, %v405_v47  ;;  %vm413_vm6 = vmor %vm411_vm5, %vm412_vm4 }
 0x172   :  { %v380_v41 = vsel %vm377_vm2, %v379_v49, %v375_v43  ;;  %v394_v0 = vsel %vm393_vm1, %v1467_v46, %v390_v62  ;;  %v408_v38 = vsub.f32 1.0, %v407_v55 }
 0x173   :  { %v399_v58 = vsel %vm396_vm3, %v398_v51, %v394_v0  ;;  %v422_v37 = vmul.f32 %v1471_v53, %v380_v41  ;;  %vm416_vm7 = vcmp.eq.f32.partialorder %v415_v52, 8.507059e+37  ;;  %v429_v41 = vld [vmem:[#allocation5 + $0x50] sm:$0xff] }
 0x174   :  { %v421_v35 = vmul.f32 %v399_v58, %v2049_v45  ;;  %v409_v1 = vmul.f32 %v1469_v50, %v408_v38 }
 0x176   :  { %v2117_v63 = vadd.f32 %v422_v37, %v421_v35  ;;  %v410_v42 = vadd.f32 %v1469_v50, %v409_v1 }
 0x178   :  { %1472 = vtanh.f32 %v2117_v63  ;;  %v414_v57 = vsel %vm413_vm6, %v1469_v50, %v410_v42 }
 0x179   :  { %v419_v54 = vsel %vm416_vm7, %v418_v39, %v414_v57 }
 0x17e   :  { %v1473_v46 = vpop.eup %1472 }
 0x17f   :  { %v425_v59 = vmul.f32 %v1473_v46, %v419_v54 }
 0x181   :  { %447 = vmatmul.f32.vlgmr.msra.gmra.mxu0 %v425_v59  ;;  %467 = vmatmul.f32.vlgmr.msra.gmra.mxu1 %v425_v59 }
 0x182   :  { %487 = vmatmul.f32.vlgmr.msra.gmra.mxu2 %v425_v59  ;;  %507 = vmatmul.f32.vlgmr.msra.gmra.mxu3 %v425_v59 }
 0x183   :  { %735 = vmatpush.msra.mxu0 %v2714_v61  ;;  %755 = vmatpush.msra.mxu1 %v1731_v2  ;;  %v2741_v2 = vld [vmem:[#allocation25_spill] sm:$0xff] }
 0x184   :  { %775 = vmatpush.msra.mxu2 %v1775_v18  ;;  %795 = vmatpush.msra.mxu3 %v1733_v3  ;;  %v2742_v3 = vld [vmem:[#allocation12_spill] sm:$0xff]  ;;  %v2757_v18 = vld [vmem:[#allocation35_spill] sm:$0xff] }
 0x185   :  { %736 = vmatpush.msra.mxu0 %v1737_v4  ;;  %756 = vmatpush.msra.mxu1 %v1739_v5  ;;  %v2743_v4 = vld [vmem:[#allocation13_spill] sm:$0xff]  ;;  %v2744_v5 = vld [vmem:[#allocation14_spill] sm:$0xff] }
 0x186   :  { %776 = vmatpush.msra.mxu2 %v1781_v20  ;;  %796 = vmatpush.msra.mxu3 %v1741_v6  ;;  %v2745_v6 = vld [vmem:[#allocation29_spill] sm:$0xff]  ;;  %v2759_v20 = vld [vmem:[#allocation26_spill] sm:$0xff] }
 0x187   :  { %737 = vmatpush.msra.mxu0 %v1744_v7  ;;  %757 = vmatpush.msra.mxu1 %v1746_v8  ;;  %v2746_v7 = vld [vmem:[#allocation15_spill] sm:$0xff]  ;;  %v2747_v8 = vld [vmem:[#allocation16_spill] sm:$0xff] }
 0x188   :  { %777 = vmatpush.msra.mxu2 %v1793_v24  ;;  %797 = vmatpush.msra.mxu3 %v1750_v9  ;;  %v2748_v9 = vld [vmem:[#allocation17_spill] sm:$0xff]  ;;  %v2763_v24 = vld [vmem:[#allocation30_spill] sm:$0xff] }
 0x189   :  { %738 = vmatpush.msra.mxu0 %v1753_v10  ;;  %758 = vmatpush.msra.mxu1 %v1755_v11  ;;  %v2749_v10 = vld [vmem:[#allocation33_spill] sm:$0xff]  ;;  %v2750_v11 = vld [vmem:[#allocation18_spill] sm:$0xff] }
 0x18a   :  { %778 = vmatpush.msra.mxu2 %v1805_v28  ;;  %798 = vmatpush.msra.mxu3 %v1759_v12  ;;  %v2751_v12 = vld [vmem:[#allocation19_spill] sm:$0xff] }
 0x18b   :  { %739 = vmatpush.msra.mxu0 %v1762_v13  ;;  %759 = vmatpush.msra.mxu1 %v1764_v14  ;;  %v2752_v13 = vld [vmem:[#allocation20_spill] sm:$0xff]  ;;  %v2753_v14 = vld [vmem:[#allocation34_spill] sm:$0xff]  ;;  %v427_v28 = vld [vmem:[#allocation5 + $0x40] sm:$0xff] }
 0x18c   :  { %779 = vmatpush.msra.mxu2 %v1817_v32  ;;  %799 = vmatpush.msra.mxu3 %v1768_v15  ;;  %v2754_v15 = vld [vmem:[#allocation21_spill] sm:$0xff] }
 0x18d   :  { %740 = vmatpush.msra.mxu0 %v1771_v16  ;;  %760 = vmatpush.msra.mxu1 %v1773_v17  ;;  %v2755_v16 = vld [vmem:[#allocation22_spill] sm:$0xff]  ;;  %v2756_v17 = vld [vmem:[#allocation23_spill] sm:$0xff] }
 0x18e   :  { %780 = vmatpush.msra.mxu2 %v1829_v36  ;;  %800 = vmatpush.msra.mxu3 %v1779_v19  ;;  %v2758_v19 = vld [vmem:[#allocation24_spill] sm:$0xff] }
 0x18f   :  { %741 = vmatpush.msra.mxu0 %v1784_v21  ;;  %761 = vmatpush.msra.mxu1 %v1786_v22  ;;  %v2760_v21 = vld [vmem:[#allocation27_spill] sm:$0xff]  ;;  %v2761_v22 = vld [vmem:[#allocation36_spill] sm:$0xff] }
 0x190   :  { %781 = vmatpush.msra.mxu2 %v1841_v40  ;;  %801 = vmatpush.msra.mxu3 %v1791_v23  ;;  %v2762_v23 = vld [vmem:[#allocation28_spill] sm:$0xff]  ;;  %v430_v40 = vld [vmem:[#allocation5 + $0x58] sm:$0xff] }
 0x191   :  { %742 = vmatpush.msra.mxu0 %v1796_v25  ;;  %762 = vmatpush.msra.mxu1 %v1798_v26  ;;  %v2764_v25 = vld [vmem:[#allocation31_spill] sm:$0xff]  ;;  %v2765_v26 = vld [vmem:[#allocation37_spill] sm:$0xff] }
 0x192   :  { %782 = vmatpush.msra.mxu2 %v1853_v44  ;;  %802 = vmatpush.msra.mxu3 %v1803_v27  ;;  %v2766_v27 = vld [vmem:[#allocation32_spill] sm:$0xff] }
 0x193   :  { %743 = vmatpush.msra.mxu0 %v1808_v29  ;;  %763 = vmatpush.msra.mxu1 %v1810_v30  ;;  %v428_v29 = vld [vmem:[#allocation5 + $0x48] sm:$0xff] }
 0x194   :  { %783 = vmatpush.msra.mxu2 %v1865_v48  ;;  %803 = vmatpush.msra.mxu3 %v1815_v31 }
 0x195   :  { %744 = vmatpush.msra.mxu0 %v1820_v33  ;;  %764 = vmatpush.msra.mxu1 %v1822_v34 }
 0x196   :  { %784 = vmatpush.msra.mxu2 %v2741_v2  ;;  %804 = vmatpush.msra.mxu3 %v2742_v3 }
 0x197   :  { %745 = vmatpush.msra.mxu0 %v2743_v4  ;;  %765 = vmatpush.msra.mxu1 %v2744_v5 }
 0x198   :  { %785 = vmatpush.msra.mxu2 %v2745_v6  ;;  %805 = vmatpush.msra.mxu3 %v2746_v7 }
 0x199   :  { %746 = vmatpush.msra.mxu0 %v2747_v8  ;;  %766 = vmatpush.msra.mxu1 %v2748_v9 }
 0x19a   :  { %786 = vmatpush.msra.mxu2 %v2749_v10  ;;  %806 = vmatpush.msra.mxu3 %v2750_v11 }
 0x19b   :  { %747 = vmatpush.msra.mxu0 %v2751_v12  ;;  %767 = vmatpush.msra.mxu1 %v2752_v13 }
 0x19c   :  { %787 = vmatpush.msra.mxu2 %v2753_v14  ;;  %807 = vmatpush.msra.mxu3 %v2754_v15 }
 0x19d   :  { %748 = vmatpush.msra.mxu0 %v2755_v16  ;;  %768 = vmatpush.msra.mxu1 %v2756_v17 }
 0x19e   :  { %788 = vmatpush.msra.mxu2 %v2757_v18  ;;  %808 = vmatpush.msra.mxu3 %v2758_v19 }
 0x19f   :  { %749 = vmatpush.msra.mxu0 %v2759_v20  ;;  %769 = vmatpush.msra.mxu1 %v2760_v21 }
 0x1a0   :  { %789 = vmatpush.msra.mxu2 %v2761_v22  ;;  %809 = vmatpush.msra.mxu3 %v2762_v23  ;;  %v2191_v22 = vld [vmem:[#allocation7 + $0x1e8] sm:$0xff]  ;;  %v2194_v23 = vld [vmem:[#allocation7 + $0x1f0] sm:$0xff] }
 0x1a1   :  { %750 = vmatpush.msra.mxu0 %v2763_v24  ;;  %770 = vmatpush.msra.mxu1 %v2764_v25  ;;  %v2197_v24 = vld [vmem:[#allocation7 + $0x1f8] sm:$0xff]  ;;  %v2200_v25 = vld [vmem:[#allocation7 + $0x1c0] sm:$0xff] }
 0x1a2   :  { %790 = vmatpush.msra.mxu2 %v2765_v26  ;;  %810 = vmatpush.msra.mxu3 %v2766_v27  ;;  %v2203_v26 = vld [vmem:[#allocation7 + $0x1c8] sm:$0xff]  ;;  %v2206_v27 = vld [vmem:[#allocation7 + $0x1d0] sm:$0xff] }
 0x1fe   :  { %v448_v30 = vpop.f32.mrf.mxu0  ;;  %v468_v31 = vpop.f32.mrf.mxu1 }
 0x1ff   :  { %v511_v32 = vadd.f32 %v448_v30, %v427_v28  ;;  %v512_v33 = vadd.f32 %v468_v31, %v428_v29  ;;  %v2209_v28 = vld [vmem:[#allocation7 + $0x1d8] sm:$0xff]  ;;  %v2212_v29 = vld [vmem:[#allocation7 + $0x1a0] sm:$0xff]  ;;  %v2215_v30 = vld [vmem:[#allocation7 + $0x1a8] sm:$0xff] }
 0x200   :  { %v2218_v31 = vld [vmem:[#allocation7 + $0x1b0] sm:$0xff] }
 0x201   :  { %v1417_v34 = vmul.f32 -1.442695, %v511_v32  ;;  %v1418_v36 = vmul.f32 -1.442695, %v512_v33  ;;  %v2221_v32 = vld [vmem:[#allocation7 + $0x1b8] sm:$0xff]  ;;  %v2224_v33 = vld [vmem:[#allocation7 + $0x180] sm:$0xff] }
 0x203   :  { %1474 = vpow2.f32 %v1417_v34  ;;  %v2227_v34 = vld [vmem:[#allocation7 + $0x188] sm:$0xff] }
 0x204   :  { %1476 = vpow2.f32 %v1418_v36  ;;  %v2230_v36 = vld [vmem:[#allocation7 + $0x190] sm:$0xff] }
 0x205   :  { %v508_v44 = vpop.f32.mrf.mxu3  ;;  %v488_v50 = vpop.f32.mrf.mxu2 }
 0x206   :  { %v514_v48 = vadd.f32 %v508_v44, %v430_v40  ;;  %v513_v62 = vadd.f32 %v488_v50, %v429_v41  ;;  %v2233_v40 = vld [vmem:[#allocation7 + $0x198] sm:$0xff]  ;;  %v2236_v44 = vld [vmem:[#allocation7 + $0x160] sm:$0xff] }
 0x207   :  { %v2257_v41 = vld [vmem:[#allocation7 + $0x158] sm:$0xff]  ;;  %v2260_v50 = vld [vmem:[#allocation7 + $0x120] sm:$0xff] }
 0x208   :  { %v1419_v61 = vmul.f32 -1.442695, %v514_v48  ;;  %v2239_v48 = vld [vmem:[#allocation7 + $0x168] sm:$0xff] }
 0x209   :  { %v1475_v45 = vpop.eup %1474 }
 0x20a   :  { %v1477_v35 = vpop.eup %1476  ;;  %v518_v37 = vadd.f32 1.0, %v1475_v45  ;;  %1478 = vpow2.f32 %v1419_v61  ;;  %v2242_v61 = vld [vmem:[#allocation7 + $0x170] sm:$0xff]  ;;  %v2245_v45 = vld [vmem:[#allocation7 + $0x178] sm:$0xff] }
 0x20b   :  { %v537_v38 = vadd.f32 1.0, %v1477_v35  ;;  %v2248_v35 = vld [vmem:[#allocation7 + $0x140] sm:$0xff] }
 0x20c   :  { %1480 = vrcp.f32 %v518_v37  ;;  %v530_v58 = vand.u32 2147483648, %v518_v37  ;;  %v528_v60 = vand.u32 2147483647, %v518_v37  ;;  %vm524_vm10 = vweird.f32 %v518_v37 }
 0x20d   :  { %1482 = vrcp.f32 %v537_v38  ;;  %v549_v1 = vand.u32 2147483648, %v537_v38  ;;  %v547_v57 = vand.u32 2147483647, %v537_v38  ;;  %vm543_vm11 = vweird.f32 %v537_v38 }
 0x20e   :  { %v531_v54 = vor.u32 1.1754944e-38, %v530_v58  ;;  %vm529_vm14 = vcmp.eq.f32.partialorder %v528_v60, 8.507059e+37  ;;  %v2290_v58 = vld [vmem:[#allocation7 + $0xf0] sm:$0xff]  ;;  %v2299_v60 = vld [vmem:[#allocation7 + $0xc8] sm:$0xff] }
 0x20f   :  { %v550_v3 = vor.u32 1.1754944e-38, %v549_v1  ;;  %vm548_vm15 = vcmp.eq.f32.partialorder %v547_v57, 8.507059e+37  ;;  %v2293_v1 = vld [vmem:[#allocation7 + $0xf8] sm:$0xff] }
 0x210   :  { %v1479_v47 = vpop.eup %1478  ;;  %v2305_v57 = vld [vmem:[#allocation7 + $0xd8] sm:$0xff] }
 0x211   :  { %v557_v56 = vadd.f32 1.0, %v1479_v47  ;;  %v2263_v47 = vld [vmem:[#allocation7 + $0x128] sm:$0xff]  ;;  %2768 = vst [vmem:[#allocation25_spill] sm:$0xff] %v2305_v57 }
 0x212   :  { %v1481_v49 = vpop.eup %1480 }
 0x213   :  { %v1483_v55 = vpop.eup %1482  ;;  %v520_v51 = vmul.f32 %v1481_v49, %v518_v37  ;;  %1484 = vrcp.f32 %v557_v56  ;;  %vm525_vm8 = vweird.f32 %v1481_v49  ;;  %v569_v15 = vand.u32 2147483648, %v557_v56  ;;  %v2251_v37 = vld [vmem:[#allocation7 + $0x148] sm:$0xff] }
 0x214   :  { %v539_v43 = vmul.f32 %v1483_v55, %v537_v38  ;;  %1486 = vtanh.f32 %v513_v62  ;;  %vm544_vm9 = vweird.f32 %v1483_v55  ;;  %vm526_vm12 = vmor %vm524_vm10, %vm525_vm8  ;;  %vm563_vm1 = vweird.f32 %v557_v56  ;;  %v2254_v38 = vld [vmem:[#allocation7 + $0x150] sm:$0xff]  ;;  %v2272_v62 = vld [vmem:[#allocation7 + $0x100] sm:$0xff] }
 0x215   :  { %v521_v53 = vsub.f32 1.0, %v520_v51  ;;  %vm545_vm13 = vmor %vm543_vm11, %vm544_vm9  ;;  %v567_v16 = vand.u32 2147483647, %v557_v56  ;;  %v570_v18 = vor.u32 1.1754944e-38, %v569_v15  ;;  %v2278_v51 = vld [vmem:[#allocation7 + $0x110] sm:$0xff]  ;;  %v2356_v15 = vld [vmem:[#allocation7 + $0x20] sm:$0xff] }
 0x216   :  { %v540_v0 = vsub.f32 1.0, %v539_v43  ;;  %v2281_v43 = vld [vmem:[#allocation7 + $0x118] sm:$0xff]  ;;  %2785 = vst [vmem:[#allocation24_spill] sm:$0xff] %v2356_v15 }
 0x217   :  { %v522_v42 = vmul.f32 %v1481_v49, %v521_v53  ;;  %vm568_vm3 = vcmp.eq.f32.partialorder %v567_v16, 8.507059e+37  ;;  %v2284_v53 = vld [vmem:[#allocation7 + $0xe0] sm:$0xff]  ;;  %v2359_v16 = vld [vmem:[#allocation7 + $0x28] sm:$0xff] }
 0x218   :  { %v541_v52 = vmul.f32 %v1483_v55, %v540_v0  ;;  %v2287_v0 = vld [vmem:[#allocation7 + $0xe8] sm:$0xff]  ;;  %2786 = vst [vmem:[#allocation26_spill] sm:$0xff] %v2359_v16 }
 0x219   :  { %v1485_v39 = vpop.eup %1484  ;;  %v523_v46 = vadd.f32 %v1481_v49, %v522_v42  ;;  %v2296_v42 = vld [vmem:[#allocation7 + $0xc0] sm:$0xff] }
 0x21a   :  { %v542_v59 = vadd.f32 %v1483_v55, %v541_v52  ;;  %v559_v2 = vmul.f32 %v1485_v39, %v557_v56  ;;  %v1487_v5 = vpop.eup %1486  ;;  %vm564_vm0 = vweird.f32 %v1485_v39  ;;  %v2266_v56 = vld [vmem:[#allocation7 + $0x130] sm:$0xff] }
 0x21b   :  { %v527_v4 = vsel %vm526_vm12, %v1481_v49, %v523_v46  ;;  %vm565_vm2 = vmor %vm563_vm1, %vm564_vm0  ;;  %v2269_v49 = vld [vmem:[#allocation7 + $0x138] sm:$0xff]  ;;  %v2302_v52 = vld [vmem:[#allocation7 + $0xd0] sm:$0xff] }
 0x21c   :  { %v532_v6 = vsel %vm529_vm14, %v531_v54, %v527_v4  ;;  %v546_v7 = vsel %vm545_vm13, %v1483_v55, %v542_v59  ;;  %v560_v8 = vsub.f32 1.0, %v559_v2  ;;  %v2275_v55 = vld [vmem:[#allocation7 + $0x108] sm:$0xff]  ;;  %2767 = vst [vmem:[#allocation11_spill] sm:$0xff] %v2302_v52  ;;  %v2314_v54 = vld [vmem:[#allocation7 + $0xb0] sm:$0xff]  ;;  %v2317_v59 = vld [vmem:[#allocation7 + $0xb8] sm:$0xff] }
 0x21d   :  { %v551_v9 = vsel %vm548_vm15, %v550_v3, %v546_v7  ;;  %v574_v10 = vmul.f32 %v1487_v5, %v532_v6  ;;  %v2311_v46 = vld [vmem:[#allocation7 + $0xa8] sm:$0xff]  ;;  %2771 = vst [vmem:[#allocation14_spill] sm:$0xff] %v2314_v54  ;;  %v2320_v2 = vld [vmem:[#allocation7 + $0x80] sm:$0xff]  ;;  %v2326_v4 = vld [vmem:[#allocation7 + $0x90] sm:$0xff] }
 0x21e   :  { %v573_v11 = vmul.f32 %v551_v9, %v2117_v63  ;;  %v561_v12 = vmul.f32 %v1485_v39, %v560_v8  ;;  %v2188_v63 = vld [vmem:[#allocation7 + $0x1e0] sm:$0xff]  ;;  %2770 = vst [vmem:[#allocation13_spill] sm:$0xff] %v2311_v46  ;;  %v2323_v3 = vld [vmem:[#allocation7 + $0x88] sm:$0xff]  ;;  %v2329_v5 = vld [vmem:[#allocation7 + $0x98] sm:$0xff] }
 0x21f   :  { %2772 = vst [vmem:[#allocation29_spill] sm:$0xff] %v2317_v59  ;;  %v2332_v6 = vld [vmem:[#allocation7 + $0x60] sm:$0xff]  ;;  %v2335_v7 = vld [vmem:[#allocation7 + $0x68] sm:$0xff]  ;;  %v2338_v8 = vld [vmem:[#allocation7 + $0x70] sm:$0xff] }
 0x220   :  { %v2185_v13 = vadd.f32 %v574_v10, %v573_v11  ;;  %v562_v14 = vadd.f32 %v1485_v39, %v561_v12  ;;  %2773 = vst [vmem:[#allocation15_spill] sm:$0xff] %v2320_v2  ;;  %v2341_v9 = vld [vmem:[#allocation7 + $0x78] sm:$0xff]  ;;  %v2344_v10 = vld [vmem:[#allocation7 + $0x40] sm:$0xff]  ;;  %v2347_v11 = vld [vmem:[#allocation7 + $0x48] sm:$0xff] }
 0x221   :  { %2774 = vst [vmem:[#allocation16_spill] sm:$0xff] %v2323_v3  ;;  %v2350_v12 = vld [vmem:[#allocation7 + $0x50] sm:$0xff] }
 0x222   :  { %1488 = vtanh.f32 %v2185_v13  ;;  %v566_v17 = vsel %vm565_vm2, %v1485_v39, %v562_v14  ;;  %v2308_v39 = vld [vmem:[#allocation7 + $0xa0] sm:$0xff]  ;;  %2775 = vst [vmem:[#allocation17_spill] sm:$0xff] %v2326_v4  ;;  %v2353_v14 = vld [vmem:[#allocation7 + $0x58] sm:$0xff] }
 0x223   :  { %v571_v20 = vsel %vm568_vm3, %v570_v18, %v566_v17  ;;  %2769 = vst [vmem:[#allocation12_spill] sm:$0xff] %v2308_v39  ;;  %v2362_v17 = vld [vmem:[#allocation7 + $0x30] sm:$0xff]  ;;  %v2365_v18 = vld [vmem:[#allocation7 + $0x38] sm:$0xff] }
 0x224   :  { %2776 = vst [vmem:[#allocation33_spill] sm:$0xff] %v2329_v5 }
 0x225   :  { %2777 = vst [vmem:[#allocation18_spill] sm:$0xff] %v2332_v6 }
 0x226   :  { %2778 = vst [vmem:[#allocation19_spill] sm:$0xff] %v2335_v7 }
 0x227   :  { %2779 = vst [vmem:[#allocation20_spill] sm:$0xff] %v2338_v8 }
 0x228   :  { %v1489_v19 = vpop.eup %1488  ;;  %2780 = vst [vmem:[#allocation34_spill] sm:$0xff] %v2341_v9 }
 0x229   :  { %v577_v21 = vmul.f32 %v1489_v19, %v571_v20  ;;  %2781 = vst [vmem:[#allocation21_spill] sm:$0xff] %v2344_v10  ;;  %v2368_v19 = vld [vmem:[#allocation7] sm:$0xff]  ;;  %v2371_v20 = vld [vmem:[#allocation7 + $0x8] sm:$0xff] }
 0x22a   :  { %2782 = vst [vmem:[#allocation22_spill] sm:$0xff] %v2347_v11 }
 0x22b   :  { %599 = vmatmul.f32.vlgmr.msrb.gmra.mxu0 %v577_v21  ;;  %619 = vmatmul.f32.vlgmr.msrb.gmra.mxu1 %v577_v21  ;;  %2783 = vst [vmem:[#allocation23_spill] sm:$0xff] %v2350_v12 }
 0x22c   :  { %639 = vmatmul.f32.vlgmr.msrb.gmra.mxu2 %v577_v21  ;;  %659 = vmatmul.f32.vlgmr.msrb.gmra.mxu3 %v577_v21  ;;  %2784 = vst [vmem:[#allocation35_spill] sm:$0xff] %v2353_v14  ;;  %v2374_v21 = vld [vmem:[#allocation7 + $0x10] sm:$0xff] }
 0x22d   :  { %887 = vmatpush.msrb.mxu0 %v2188_v63  ;;  %907 = vmatpush.msrb.mxu1 %v2191_v22  ;;  %2787 = vst [vmem:[#allocation27_spill] sm:$0xff] %v2362_v17 }
 0x22e   :  { %927 = vmatpush.msrb.mxu2 %v2194_v23  ;;  %947 = vmatpush.msrb.mxu3 %v2197_v24  ;;  %2788 = vst [vmem:[#allocation36_spill] sm:$0xff] %v2365_v18 }
 0x22f   :  { %888 = vmatpush.msrb.mxu0 %v2200_v25  ;;  %908 = vmatpush.msrb.mxu1 %v2203_v26  ;;  %2789 = vst [vmem:[#allocation28_spill] sm:$0xff] %v2368_v19 }
 0x230   :  { %928 = vmatpush.msrb.mxu2 %v2206_v27  ;;  %948 = vmatpush.msrb.mxu3 %v2209_v28  ;;  %2790 = vst [vmem:[#allocation30_spill] sm:$0xff] %v2371_v20 }
 0x231   :  { %889 = vmatpush.msrb.mxu0 %v2212_v29  ;;  %909 = vmatpush.msrb.mxu1 %v2215_v30  ;;  %2791 = vst [vmem:[#allocation31_spill] sm:$0xff] %v2374_v21 }
 0x232   :  { %929 = vmatpush.msrb.mxu2 %v2218_v31  ;;  %949 = vmatpush.msrb.mxu3 %v2221_v32 }
 0x233   :  { %890 = vmatpush.msrb.mxu0 %v2224_v33  ;;  %910 = vmatpush.msrb.mxu1 %v2227_v34 }
 0x234   :  { %930 = vmatpush.msrb.mxu2 %v2230_v36  ;;  %950 = vmatpush.msrb.mxu3 %v2233_v40 }
 0x235   :  { %891 = vmatpush.msrb.mxu0 %v2236_v44  ;;  %911 = vmatpush.msrb.mxu1 %v2239_v48 }
 0x236   :  { %931 = vmatpush.msrb.mxu2 %v2242_v61  ;;  %951 = vmatpush.msrb.mxu3 %v2245_v45 }
 0x237   :  { %892 = vmatpush.msrb.mxu0 %v2248_v35  ;;  %912 = vmatpush.msrb.mxu1 %v2251_v37 }
 0x238   :  { %932 = vmatpush.msrb.mxu2 %v2254_v38  ;;  %952 = vmatpush.msrb.mxu3 %v2257_v41 }
 0x239   :  { %893 = vmatpush.msrb.mxu0 %v2260_v50  ;;  %913 = vmatpush.msrb.mxu1 %v2263_v47 }
 0x23a   :  { %933 = vmatpush.msrb.mxu2 %v2266_v56  ;;  %953 = vmatpush.msrb.mxu3 %v2269_v49 }
 0x23b   :  { %894 = vmatpush.msrb.mxu0 %v2272_v62  ;;  %914 = vmatpush.msrb.mxu1 %v2275_v55 }
 0x23c   :  { %934 = vmatpush.msrb.mxu2 %v2278_v51  ;;  %954 = vmatpush.msrb.mxu3 %v2281_v43 }
 0x23d   :  { %895 = vmatpush.msrb.mxu0 %v2284_v53  ;;  %915 = vmatpush.msrb.mxu1 %v2287_v0 }
 0x23e   :  { %935 = vmatpush.msrb.mxu2 %v2290_v58  ;;  %955 = vmatpush.msrb.mxu3 %v2293_v1 }
 0x23f   :  { %896 = vmatpush.msrb.mxu0 %v2296_v42  ;;  %916 = vmatpush.msrb.mxu1 %v2299_v60 }
 0x240   :  { %936 = vmatpush.msrb.mxu2 %v2302_v52  ;;  %956 = vmatpush.msrb.mxu3 %v2305_v57 }
 0x241   :  { %897 = vmatpush.msrb.mxu0 %v2308_v39  ;;  %917 = vmatpush.msrb.mxu1 %v2311_v46 }
 0x242   :  { %937 = vmatpush.msrb.mxu2 %v2314_v54  ;;  %957 = vmatpush.msrb.mxu3 %v2317_v59 }
 0x243   :  { %898 = vmatpush.msrb.mxu0 %v2320_v2  ;;  %918 = vmatpush.msrb.mxu1 %v2323_v3 }
 0x244   :  { %938 = vmatpush.msrb.mxu2 %v2326_v4  ;;  %958 = vmatpush.msrb.mxu3 %v2329_v5 }
 0x245   :  { %899 = vmatpush.msrb.mxu0 %v2332_v6  ;;  %919 = vmatpush.msrb.mxu1 %v2335_v7 }
 0x246   :  { %939 = vmatpush.msrb.mxu2 %v2338_v8  ;;  %959 = vmatpush.msrb.mxu3 %v2341_v9  ;;  %v582_v9 = vld [vmem:[#allocation5 + $0x78] sm:$0xff] }
 0x247   :  { %900 = vmatpush.msrb.mxu0 %v2344_v10  ;;  %920 = vmatpush.msrb.mxu1 %v2347_v11 }
 0x248   :  { %940 = vmatpush.msrb.mxu2 %v2350_v12  ;;  %960 = vmatpush.msrb.mxu3 %v2353_v14 }
 0x249   :  { %901 = vmatpush.msrb.mxu0 %v2356_v15  ;;  %921 = vmatpush.msrb.mxu1 %v2359_v16  ;;  %v2377_v16 = vld [vmem:[#allocation7 + $0x18] sm:$0xff]  ;;  %v580_v15 = vld [vmem:[#allocation5 + $0x68] sm:$0xff] }
 0x24a   :  { %941 = vmatpush.msrb.mxu2 %v2362_v17  ;;  %961 = vmatpush.msrb.mxu3 %v2365_v18  ;;  %2792 = vst [vmem:[#allocation37_spill] sm:$0xff] %v2377_v16  ;;  %v579_v17 = vld [vmem:[#allocation5 + $0x60] sm:$0xff] }
 0x24b   :  { %902 = vmatpush.msrb.mxu0 %v2368_v19  ;;  %922 = vmatpush.msrb.mxu1 %v2371_v20 }
 0x24c   :  { %942 = vmatpush.msrb.mxu2 %v2374_v21  ;;  %962 = vmatpush.msrb.mxu3 %v2377_v16  ;;  %v581_v16 = vld [vmem:[#allocation5 + $0x70] sm:$0xff] }
 0x2a8   :  { %v600_v14 = vpop.f32.mrf.mxu0  ;;  %v620_v18 = vpop.f32.mrf.mxu1 }
 0x2a9   :  { %v663_v12 = vadd.f32 %v600_v14, %v579_v17  ;;  %v664_v11 = vadd.f32 %v620_v18, %v580_v15 }
 0x2ab   :  { %v1420_v10 = vmul.f32 -1.442695, %v663_v12  ;;  %v1421_v19 = vmul.f32 -1.442695, %v664_v11 }
 0x2ad   :  { %1490 = vpow2.f32 %v1420_v10 }
 0x2ae   :  { %1492 = vpow2.f32 %v1421_v19 }
 0x2af   :  { %v660_v20 = vpop.f32.mrf.mxu3  ;;  %v640_v3 = vpop.f32.mrf.mxu2 }
 0x2b0   :  { %v666_v8 = vadd.f32 %v660_v20, %v582_v9  ;;  %v665_v12 = vadd.f32 %v640_v3, %v581_v16 }
 0x2b2   :  { %v1422_v7 = vmul.f32 -1.442695, %v666_v8 }
 0x2b3   :  { %v1491_v6 = vpop.eup %1490 }
 0x2b4   :  { %v1493_v21 = vpop.eup %1492  ;;  %v670_v5 = vadd.f32 1.0, %v1491_v6  ;;  %1494 = vpow2.f32 %v1422_v7 }
 0x2b5   :  { %v689_v4 = vadd.f32 1.0, %v1493_v21 }
 0x2b6   :  { %1496 = vrcp.f32 %v670_v5  ;;  %v682_v8 = vand.u32 2147483648, %v670_v5  ;;  %v680_v7 = vand.u32 2147483647, %v670_v5  ;;  %vm676_vm6 = vweird.f32 %v670_v5 }
 0x2b7   :  { %1498 = vrcp.f32 %v689_v4  ;;  %v701_v19 = vand.u32 2147483648, %v689_v4  ;;  %v699_v21 = vand.u32 2147483647, %v689_v4  ;;  %vm695_vm7 = vweird.f32 %v689_v4 }
 0x2b8   :  { %vm681_vm10 = vcmp.eq.f32.partialorder %v680_v7, 8.507059e+37 }
 0x2b9   :  { %vm700_vm11 = vcmp.eq.f32.partialorder %v699_v21, 8.507059e+37  ;;  %v2800_v21 = vld [vmem:[#allocation16_spill] sm:$0xff] }
 0x2ba   :  { %v1495_v2 = vpop.eup %1494 }
 0x2bb   :  { %v709_v14 = vadd.f32 1.0, %v1495_v2  ;;  %v683_v2 = vor.u32 1.1754944e-38, %v682_v8 }
 0x2bc   :  { %v1497_v15 = vpop.eup %1496 }
 0x2bd   :  { %v1499_v11 = vpop.eup %1498  ;;  %v672_v10 = vmul.f32 %v1497_v15, %v670_v5  ;;  %1500 = vrcp.f32 %v709_v14  ;;  %vm677_vm4 = vweird.f32 %v1497_v15  ;;  %v721_v8 = vand.u32 2147483648, %v709_v14 }
 0x2be   :  { %v691_v17 = vmul.f32 %v1499_v11, %v689_v4  ;;  %1502 = vtanh.f32 %v665_v12  ;;  %vm696_vm5 = vweird.f32 %v1499_v11  ;;  %vm678_vm8 = vmor %vm676_vm6, %vm677_vm4  ;;  %vm715_vm13 = vweird.f32 %v709_v14 }
 0x2bf   :  { %v673_v18 = vsub.f32 1.0, %v672_v10  ;;  %vm697_vm9 = vmor %vm695_vm7, %vm696_vm5  ;;  %v702_v10 = vor.u32 1.1754944e-38, %v701_v19  ;;  %v722_v19 = vor.u32 1.1754944e-38, %v721_v8  ;;  %v2811_v8 = vld [vmem:[#allocation24_spill] sm:$0xff] }
 0x2c0   :  { %v692_v9 = vsub.f32 1.0, %v691_v17 }
 0x2c1   :  { %v674_v6 = vmul.f32 %v1497_v15, %v673_v18 }
 0x2c2   :  { %v693_v20 = vmul.f32 %v1499_v11, %v692_v9 }
 0x2c3   :  { %v1501_v59 = vpop.eup %1500  ;;  %v675_v54 = vadd.f32 %v1497_v15, %v674_v6 }
 0x2c4   :  { %v694_v3 = vadd.f32 %v1499_v11, %v693_v20  ;;  %v711_v16 = vmul.f32 %v1501_v59, %v709_v14  ;;  %v1503_v12 = vpop.eup %1502  ;;  %vm716_vm12 = vweird.f32 %v1501_v59 }
 0x2c5   :  { %v679_v17 = vsel %vm678_vm8, %v1497_v15, %v675_v54  ;;  %v719_v54 = vand.u32 2147483647, %v709_v14  ;;  %vm717_vm14 = vmor %vm715_vm13, %vm716_vm12  ;;  %v2799_v14 = vld [vmem:[#allocation15_spill] sm:$0xff] }
 0x2c6   :  { %v684_v46 = vsel %vm681_vm10, %v683_v2, %v679_v17  ;;  %v698_v18 = vsel %vm697_vm9, %v1499_v11, %v694_v3  ;;  %v712_v39 = vsub.f32 1.0, %v711_v16  ;;  %v2801_v2 = vld [vmem:[#allocation17_spill] sm:$0xff]  ;;  %v2803_v16 = vld [vmem:[#allocation18_spill] sm:$0xff]  ;;  %v2805_v17 = vld [vmem:[#allocation20_spill] sm:$0xff] }
 0x2c7   :  { %v703_v9 = vsel %vm700_vm11, %v702_v10, %v698_v18  ;;  %v726_v57 = vmul.f32 %v1503_v12, %v684_v46  ;;  %vm720_vm15 = vcmp.eq.f32.partialorder %v719_v54, 8.507059e+37  ;;  %v2797_v46 = vld [vmem:[#allocation14_spill] sm:$0xff]  ;;  %v2802_v3 = vld [vmem:[#allocation33_spill] sm:$0xff]  ;;  %v2804_v10 = vld [vmem:[#allocation19_spill] sm:$0xff] }
 0x2c8   :  { %v725_v52 = vmul.f32 %v703_v9, %v2185_v13  ;;  %v713_v6 = vmul.f32 %v1501_v59, %v712_v39  ;;  %v2793_v13 = vld [vmem:[#allocation11_spill] sm:$0xff]  ;;  %v2796_v39 = vld [vmem:[#allocation13_spill] sm:$0xff]  ;;  %v2806_v12 = vld [vmem:[#allocation34_spill] sm:$0xff] }
 0x2c9   :  { %v2807_v18 = vld [vmem:[#allocation21_spill] sm:$0xff]  ;;  %v2808_v9 = vld [vmem:[#allocation22_spill] sm:$0xff] }
 0x2ca   :  { %v2381_v5 = vadd.f32 %v726_v57, %v725_v52  ;;  %v714_v4 = vadd.f32 %v1501_v59, %v713_v6  ;;  %v2794_v52 = vld [vmem:[#allocation25_spill] sm:$0xff]  ;;  %v2795_v57 = vld [vmem:[#allocation12_spill] sm:$0xff]  ;;  %v2809_v6 = vld [vmem:[#allocation23_spill] sm:$0xff] }
 0x2cb   :  { %v2812_v54 = vld [vmem:[#allocation26_spill] sm:$0xff] }
 0x2cc   :  { %1504 = vtanh.f32 %v2381_v5  ;;  %v718_v15 = vsel %vm717_vm14, %v1501_v59, %v714_v4  ;;  %v2798_v59 = vld [vmem:[#allocation29_spill] sm:$0xff]  ;;  %v2810_v4 = vld [vmem:[#allocation35_spill] sm:$0xff] }
 0x2cd   :  { %v723_v7 = vsel %vm720_vm15, %v722_v19, %v718_v15  ;;  %v2813_v15 = vld [vmem:[#allocation27_spill] sm:$0xff]  ;;  %v2814_v19 = vld [vmem:[#allocation36_spill] sm:$0xff] }
 0x2d2   :  { %v1505_v11 = vpop.eup %1504 }
 0x2d3   :  { %v729_v20 = vmul.f32 %v1505_v11, %v723_v7  ;;  %v2815_v11 = vld [vmem:[#allocation28_spill] sm:$0xff]  ;;  %v2816_v7 = vld [vmem:[#allocation30_spill] sm:$0xff] }
 0x2d5   :  { %751 = vmatmul.f32.vlgmr.msra.gmra.mxu0 %v729_v20  ;;  %771 = vmatmul.f32.vlgmr.msra.gmra.mxu1 %v729_v20 }
 0x2d6   :  { %791 = vmatmul.f32.vlgmr.msra.gmra.mxu2 %v729_v20  ;;  %811 = vmatmul.f32.vlgmr.msra.gmra.mxu3 %v729_v20  ;;  %v2817_v20 = vld [vmem:[#allocation31_spill] sm:$0xff] }
 0x2d7   :  { %1039 = vmatpush.msra.mxu0 %v2188_v63  ;;  %1059 = vmatpush.msra.mxu1 %v2191_v22 }
 0x2d8   :  { %1079 = vmatpush.msra.mxu2 %v2194_v23  ;;  %1099 = vmatpush.msra.mxu3 %v2197_v24 }
 0x2d9   :  { %1040 = vmatpush.msra.mxu0 %v2200_v25  ;;  %1060 = vmatpush.msra.mxu1 %v2203_v26 }
 0x2da   :  { %1080 = vmatpush.msra.mxu2 %v2206_v27  ;;  %1100 = vmatpush.msra.mxu3 %v2209_v28 }
 0x2db   :  { %1041 = vmatpush.msra.mxu0 %v2212_v29  ;;  %1061 = vmatpush.msra.mxu1 %v2215_v30 }
 0x2dc   :  { %1081 = vmatpush.msra.mxu2 %v2218_v31  ;;  %1101 = vmatpush.msra.mxu3 %v2221_v32 }
 0x2dd   :  { %1042 = vmatpush.msra.mxu0 %v2224_v33  ;;  %1062 = vmatpush.msra.mxu1 %v2227_v34 }
 0x2de   :  { %1082 = vmatpush.msra.mxu2 %v2230_v36  ;;  %1102 = vmatpush.msra.mxu3 %v2233_v40 }
 0x2df   :  { %1043 = vmatpush.msra.mxu0 %v2236_v44  ;;  %1063 = vmatpush.msra.mxu1 %v2239_v48 }
 0x2e0   :  { %1083 = vmatpush.msra.mxu2 %v2242_v61  ;;  %1103 = vmatpush.msra.mxu3 %v2245_v45 }
 0x2e1   :  { %1044 = vmatpush.msra.mxu0 %v2248_v35  ;;  %1064 = vmatpush.msra.mxu1 %v2251_v37 }
 0x2e2   :  { %1084 = vmatpush.msra.mxu2 %v2254_v38  ;;  %1104 = vmatpush.msra.mxu3 %v2257_v41 }
 0x2e3   :  { %1045 = vmatpush.msra.mxu0 %v2260_v50  ;;  %1065 = vmatpush.msra.mxu1 %v2263_v47 }
 0x2e4   :  { %1085 = vmatpush.msra.mxu2 %v2266_v56  ;;  %1105 = vmatpush.msra.mxu3 %v2269_v49 }
 0x2e5   :  { %1046 = vmatpush.msra.mxu0 %v2272_v62  ;;  %1066 = vmatpush.msra.mxu1 %v2275_v55 }
 0x2e6   :  { %1086 = vmatpush.msra.mxu2 %v2278_v51  ;;  %1106 = vmatpush.msra.mxu3 %v2281_v43 }
 0x2e7   :  { %1047 = vmatpush.msra.mxu0 %v2284_v53  ;;  %1067 = vmatpush.msra.mxu1 %v2287_v0 }
 0x2e8   :  { %1087 = vmatpush.msra.mxu2 %v2290_v58  ;;  %1107 = vmatpush.msra.mxu3 %v2293_v1 }
 0x2e9   :  { %1048 = vmatpush.msra.mxu0 %v2296_v42  ;;  %1068 = vmatpush.msra.mxu1 %v2299_v60 }
 0x2ea   :  { %1088 = vmatpush.msra.mxu2 %v2793_v13  ;;  %1108 = vmatpush.msra.mxu3 %v2794_v52 }
 0x2eb   :  { %1049 = vmatpush.msra.mxu0 %v2795_v57  ;;  %1069 = vmatpush.msra.mxu1 %v2796_v39 }
 0x2ec   :  { %1089 = vmatpush.msra.mxu2 %v2797_v46  ;;  %1109 = vmatpush.msra.mxu3 %v2798_v59 }
 0x2ed   :  { %1050 = vmatpush.msra.mxu0 %v2799_v14  ;;  %1070 = vmatpush.msra.mxu1 %v2800_v21 }
 0x2ee   :  { %1090 = vmatpush.msra.mxu2 %v2801_v2  ;;  %1110 = vmatpush.msra.mxu3 %v2802_v3 }
 0x2ef   :  { %1051 = vmatpush.msra.mxu0 %v2803_v16  ;;  %1071 = vmatpush.msra.mxu1 %v2804_v10 }
 0x2f0   :  { %1091 = vmatpush.msra.mxu2 %v2805_v17  ;;  %1111 = vmatpush.msra.mxu3 %v2806_v12 }
 0x2f1   :  { %1052 = vmatpush.msra.mxu0 %v2807_v18  ;;  %1072 = vmatpush.msra.mxu1 %v2808_v9  ;;  %v2818_v18 = vld [vmem:[#allocation37_spill] sm:$0xff]  ;;  %v731_v9 = vld [vmem:[#allocation5 + $0x80] sm:$0xff] }
 0x2f2   :  { %1092 = vmatpush.msra.mxu2 %v2809_v6  ;;  %1112 = vmatpush.msra.mxu3 %v2810_v4  ;;  %v732_v6 = vld [vmem:[#allocation5 + $0x88] sm:$0xff] }
 0x2f3   :  { %1053 = vmatpush.msra.mxu0 %v2811_v8  ;;  %1073 = vmatpush.msra.mxu1 %v2812_v54 }
 0x2f4   :  { %1093 = vmatpush.msra.mxu2 %v2813_v15  ;;  %1113 = vmatpush.msra.mxu3 %v2814_v19  ;;  %v734_v15 = vld [vmem:[#allocation5 + $0x98] sm:$0xff] }
 0x2f5   :  { %1054 = vmatpush.msra.mxu0 %v2815_v11  ;;  %1074 = vmatpush.msra.mxu1 %v2816_v7 }
 0x2f6   :  { %1094 = vmatpush.msra.mxu2 %v2817_v20  ;;  %1114 = vmatpush.msra.mxu3 %v2818_v18  ;;  %v733_v18 = vld [vmem:[#allocation5 + $0x90] sm:$0xff] }
 0x352   :  { %v752_v12 = vpop.f32.mrf.mxu0  ;;  %v772_v4 = vpop.f32.mrf.mxu1 }
 0x353   :  { %v815_v17 = vadd.f32 %v752_v12, %v731_v9  ;;  %v816_v8 = vadd.f32 %v772_v4, %v732_v6 }
 0x355   :  { %v1423_v10 = vmul.f32 -1.442695, %v815_v17  ;;  %v1424_v54 = vmul.f32 -1.442695, %v816_v8 }
 0x357   :  { %1506 = vpow2.f32 %v1423_v10 }
 0x358   :  { %1508 = vpow2.f32 %v1424_v54 }
 0x359   :  { %v812_v19 = vpop.f32.mrf.mxu3  ;;  %v792_v21 = vpop.f32.mrf.mxu2 }
 0x35a   :  { %v818_v16 = vadd.f32 %v812_v19, %v734_v15  ;;  %v817_v17 = vadd.f32 %v792_v21, %v733_v18 }
 0x35c   :  { %v1425_v11 = vmul.f32 -1.442695, %v818_v16 }
 0x35d   :  { %v1507_v3 = vpop.eup %1506 }
 0x35e   :  { %v1509_v7 = vpop.eup %1508  ;;  %v822_v2 = vadd.f32 1.0, %v1507_v3  ;;  %1510 = vpow2.f32 %v1425_v11 }
 0x35f   :  { %v841_v20 = vadd.f32 1.0, %v1509_v7 }
 0x360   :  { %1512 = vrcp.f32 %v822_v2  ;;  %v834_v16 = vand.u32 2147483648, %v822_v2  ;;  %v832_v19 = vand.u32 2147483647, %v822_v2  ;;  %vm828_vm2 = vweird.f32 %v822_v2 }
 0x361   :  { %1514 = vrcp.f32 %v841_v20  ;;  %v853_v15 = vand.u32 2147483648, %v841_v20  ;;  %v851_v7 = vand.u32 2147483647, %v841_v20  ;;  %vm847_vm3 = vweird.f32 %v841_v20 }
 0x362   :  { %vm833_vm6 = vcmp.eq.f32.partialorder %v832_v19, 8.507059e+37 }
 0x363   :  { %vm852_vm7 = vcmp.eq.f32.partialorder %v851_v7, 8.507059e+37 }
 0x364   :  { %v1511_v14 = vpop.eup %1510 }
 0x365   :  { %v861_v12 = vadd.f32 1.0, %v1511_v14  ;;  %v835_v14 = vor.u32 1.1754944e-38, %v834_v16 }
 0x366   :  { %v1513_v9 = vpop.eup %1512 }
 0x367   :  { %v1515_v6 = vpop.eup %1514  ;;  %v824_v10 = vmul.f32 %v1513_v9, %v822_v2  ;;  %1516 = vrcp.f32 %v861_v12  ;;  %vm829_vm0 = vweird.f32 %v1513_v9  ;;  %v873_v16 = vand.u32 2147483648, %v861_v12 }
 0x368   :  { %v843_v4 = vmul.f32 %v1515_v6, %v841_v20  ;;  %1518 = vtanh.f32 %v817_v17  ;;  %vm848_vm1 = vweird.f32 %v1515_v6  ;;  %vm830_vm4 = vmor %vm828_vm2, %vm829_vm0  ;;  %vm867_vm9 = vweird.f32 %v861_v12 }
 0x369   :  { %v825_v8 = vsub.f32 1.0, %v824_v10  ;;  %vm849_vm5 = vmor %vm847_vm3, %vm848_vm1  ;;  %v854_v10 = vor.u32 1.1754944e-38, %v853_v15  ;;  %v874_v15 = vor.u32 1.1754944e-38, %v873_v16 }
 0x36a   :  { %v844_v54 = vsub.f32 1.0, %v843_v4 }
 0x36b   :  { %v826_v3 = vmul.f32 %v1513_v9, %v825_v8 }
 0x36c   :  { %v845_v11 = vmul.f32 %v1515_v6, %v844_v54 }
 0x36d   :  { %v1517_v59 = vpop.eup %1516  ;;  %v827_v46 = vadd.f32 %v1513_v9, %v826_v3 }
 0x36e   :  { %v846_v21 = vadd.f32 %v1515_v6, %v845_v11  ;;  %v863_v18 = vmul.f32 %v1517_v59, %v861_v12  ;;  %v1519_v17 = vpop.eup %1518  ;;  %vm868_vm8 = vweird.f32 %v1517_v59 }
 0x36f   :  { %v831_v4 = vsel %vm830_vm4, %v1513_v9, %v827_v46  ;;  %v871_v46 = vand.u32 2147483647, %v861_v12  ;;  %vm869_vm10 = vmor %vm867_vm9, %vm868_vm8 }
 0x370   :  { %v836_v39 = vsel %vm833_vm6, %v835_v14, %v831_v4  ;;  %v850_v8 = vsel %vm849_vm5, %v1515_v6, %v846_v21  ;;  %v864_v57 = vsub.f32 1.0, %v863_v18 }
 0x371   :  { %v855_v54 = vsel %vm852_vm7, %v854_v10, %v850_v8  ;;  %v878_v52 = vmul.f32 %v1519_v17, %v836_v39  ;;  %vm872_vm11 = vcmp.eq.f32.partialorder %v871_v46, 8.507059e+37  ;;  %v885_v39 = vld [vmem:[#allocation5 + $0xb0] sm:$0xff] }
 0x372   :  { %v877_v13 = vmul.f32 %v855_v54, %v2381_v5  ;;  %v865_v3 = vmul.f32 %v1517_v59, %v864_v57 }
 0x374   :  { %v2449_v2 = vadd.f32 %v878_v52, %v877_v13  ;;  %v866_v20 = vadd.f32 %v1517_v59, %v865_v3 }
 0x376   :  { %1520 = vtanh.f32 %v2449_v2  ;;  %v870_v9 = vsel %vm869_vm10, %v1517_v59, %v866_v20 }
 0x377   :  { %v875_v19 = vsel %vm872_vm11, %v874_v15, %v870_v9 }
 0x37c   :  { %v1521_v6 = vpop.eup %1520 }
 0x37d   :  { %v881_v11 = vmul.f32 %v1521_v6, %v875_v19 }
 0x37f   :  { %903 = vmatmul.f32.vlgmr.msrb.gmra.mxu0 %v881_v11  ;;  %923 = vmatmul.f32.vlgmr.msrb.gmra.mxu1 %v881_v11 }
 0x380   :  { %943 = vmatmul.f32.vlgmr.msrb.gmra.mxu2 %v881_v11  ;;  %963 = vmatmul.f32.vlgmr.msrb.gmra.mxu3 %v881_v11 }
 0x381   :  { %1191 = vmatpush.msrb.mxu0 %v2188_v63  ;;  %1211 = vmatpush.msrb.mxu1 %v2191_v22  ;;  %v2819_v63 = vld [vmem:[#allocation11_spill] sm:$0xff]  ;;  %v2820_v22 = vld [vmem:[#allocation25_spill] sm:$0xff] }
 0x382   :  { %1231 = vmatpush.msrb.mxu2 %v2194_v23  ;;  %1251 = vmatpush.msrb.mxu3 %v2197_v24  ;;  %v2821_v23 = vld [vmem:[#allocation12_spill] sm:$0xff]  ;;  %v2822_v24 = vld [vmem:[#allocation13_spill] sm:$0xff] }
 0x383   :  { %1192 = vmatpush.msrb.mxu0 %v2200_v25  ;;  %1212 = vmatpush.msrb.mxu1 %v2203_v26  ;;  %v2823_v25 = vld [vmem:[#allocation14_spill] sm:$0xff]  ;;  %v2824_v26 = vld [vmem:[#allocation29_spill] sm:$0xff] }
 0x384   :  { %1232 = vmatpush.msrb.mxu2 %v2206_v27  ;;  %1252 = vmatpush.msrb.mxu3 %v2209_v28  ;;  %v2825_v27 = vld [vmem:[#allocation15_spill] sm:$0xff]  ;;  %v2826_v28 = vld [vmem:[#allocation16_spill] sm:$0xff] }
 0x385   :  { %1193 = vmatpush.msrb.mxu0 %v2212_v29  ;;  %1213 = vmatpush.msrb.mxu1 %v2215_v30  ;;  %v2827_v29 = vld [vmem:[#allocation17_spill] sm:$0xff] }
 0x386   :  { %1233 = vmatpush.msrb.mxu2 %v2218_v31  ;;  %1253 = vmatpush.msrb.mxu3 %v2221_v32  ;;  %v2828_v30 = vld [vmem:[#allocation33_spill] sm:$0xff]  ;;  %v2829_v31 = vld [vmem:[#allocation18_spill] sm:$0xff]  ;;  %v2830_v32 = vld [vmem:[#allocation19_spill] sm:$0xff] }
 0x387   :  { %1194 = vmatpush.msrb.mxu0 %v2224_v33  ;;  %1214 = vmatpush.msrb.mxu1 %v2227_v34  ;;  %v2831_v33 = vld [vmem:[#allocation20_spill] sm:$0xff]  ;;  %v2832_v34 = vld [vmem:[#allocation34_spill] sm:$0xff] }
 0x388   :  { %1234 = vmatpush.msrb.mxu2 %v2230_v36  ;;  %1254 = vmatpush.msrb.mxu3 %v2233_v40  ;;  %v2833_v36 = vld [vmem:[#allocation21_spill] sm:$0xff]  ;;  %v2834_v40 = vld [vmem:[#allocation22_spill] sm:$0xff] }
 0x389   :  { %1195 = vmatpush.msrb.mxu0 %v2236_v44  ;;  %1215 = vmatpush.msrb.mxu1 %v2239_v48  ;;  %v2835_v44 = vld [vmem:[#allocation23_spill] sm:$0xff] }
 0x38a   :  { %1235 = vmatpush.msrb.mxu2 %v2242_v61  ;;  %1255 = vmatpush.msrb.mxu3 %v2245_v45  ;;  %v2836_v48 = vld [vmem:[#allocation35_spill] sm:$0xff]  ;;  %v2837_v61 = vld [vmem:[#allocation24_spill] sm:$0xff]  ;;  %v2838_v45 = vld [vmem:[#allocation26_spill] sm:$0xff] }
 0x38b   :  { %1196 = vmatpush.msrb.mxu0 %v2248_v35  ;;  %1216 = vmatpush.msrb.mxu1 %v2251_v37  ;;  %v2839_v35 = vld [vmem:[#allocation27_spill] sm:$0xff]  ;;  %v2840_v37 = vld [vmem:[#allocation36_spill] sm:$0xff] }
 0x38c   :  { %1236 = vmatpush.msrb.mxu2 %v2254_v38  ;;  %1256 = vmatpush.msrb.mxu3 %v2257_v41  ;;  %v2841_v38 = vld [vmem:[#allocation28_spill] sm:$0xff]  ;;  %v2842_v41 = vld [vmem:[#allocation30_spill] sm:$0xff] }
 0x38d   :  { %1197 = vmatpush.msrb.mxu0 %v2260_v50  ;;  %1217 = vmatpush.msrb.mxu1 %v2263_v47  ;;  %v2843_v50 = vld [vmem:[#allocation31_spill] sm:$0xff]  ;;  %v2844_v47 = vld [vmem:[#allocation37_spill] sm:$0xff] }
 0x38e   :  { %1237 = vmatpush.msrb.mxu2 %v2266_v56  ;;  %1257 = vmatpush.msrb.mxu3 %v2269_v49  ;;  %v883_v56 = vld [vmem:[#allocation5 + $0xa0] sm:$0xff]  ;;  %v884_v49 = vld [vmem:[#allocation5 + $0xa8] sm:$0xff] }
 0x38f   :  { %1198 = vmatpush.msrb.mxu0 %v2272_v62  ;;  %1218 = vmatpush.msrb.mxu1 %v2275_v55 }
 0x390   :  { %1238 = vmatpush.msrb.mxu2 %v2278_v51  ;;  %1258 = vmatpush.msrb.mxu3 %v2281_v43 }
 0x391   :  { %1199 = vmatpush.msrb.mxu0 %v2284_v53  ;;  %1219 = vmatpush.msrb.mxu1 %v2287_v0 }
 0x392   :  { %1239 = vmatpush.msrb.mxu2 %v2290_v58  ;;  %1259 = vmatpush.msrb.mxu3 %v2293_v1  ;;  %v886_v58 = vld [vmem:[#allocation5 + $0xb8] sm:$0xff] }
 0x393   :  { %1200 = vmatpush.msrb.mxu0 %v2296_v42  ;;  %1220 = vmatpush.msrb.mxu1 %v2299_v60 }
 0x394   :  { %1240 = vmatpush.msrb.mxu2 %v2819_v63  ;;  %1260 = vmatpush.msrb.mxu3 %v2820_v22 }
 0x395   :  { %1201 = vmatpush.msrb.mxu0 %v2821_v23  ;;  %1221 = vmatpush.msrb.mxu1 %v2822_v24 }
 0x396   :  { %1241 = vmatpush.msrb.mxu2 %v2823_v25  ;;  %1261 = vmatpush.msrb.mxu3 %v2824_v26 }
 0x397   :  { %1202 = vmatpush.msrb.mxu0 %v2825_v27  ;;  %1222 = vmatpush.msrb.mxu1 %v2826_v28 }
 0x398   :  { %1242 = vmatpush.msrb.mxu2 %v2827_v29  ;;  %1262 = vmatpush.msrb.mxu3 %v2828_v30 }
 0x399   :  { %1203 = vmatpush.msrb.mxu0 %v2829_v31  ;;  %1223 = vmatpush.msrb.mxu1 %v2830_v32 }
 0x39a   :  { %1243 = vmatpush.msrb.mxu2 %v2831_v33  ;;  %1263 = vmatpush.msrb.mxu3 %v2832_v34 }
 0x39b   :  { %1204 = vmatpush.msrb.mxu0 %v2833_v36  ;;  %1224 = vmatpush.msrb.mxu1 %v2834_v40 }
 0x39c   :  { %1244 = vmatpush.msrb.mxu2 %v2835_v44  ;;  %1264 = vmatpush.msrb.mxu3 %v2836_v48 }
 0x39d   :  { %1205 = vmatpush.msrb.mxu0 %v2837_v61  ;;  %1225 = vmatpush.msrb.mxu1 %v2838_v45 }
 0x39e   :  { %1245 = vmatpush.msrb.mxu2 %v2839_v35  ;;  %1265 = vmatpush.msrb.mxu3 %v2840_v37  ;;  %v1036_v35 = vld [vmem:[#allocation5 + $0xc8] sm:$0xff] }
 0x39f   :  { %1206 = vmatpush.msrb.mxu0 %v2841_v38  ;;  %1226 = vmatpush.msrb.mxu1 %v2842_v41 }
 0x3a0   :  { %1246 = vmatpush.msrb.mxu2 %v2843_v50  ;;  %1266 = vmatpush.msrb.mxu3 %v2844_v47 }
 0x3fc   :  { %v904_v62 = vpop.f32.mrf.mxu0  ;;  %v924_v55 = vpop.f32.mrf.mxu1 }
 0x3fd   :  { %v967_v51 = vadd.f32 %v904_v62, %v883_v56  ;;  %v968_v43 = vadd.f32 %v924_v55, %v884_v49  ;;  %v1038_v49 = vld [vmem:[#allocation5 + $0xd8] sm:$0xff] }
 0x3ff   :  { %v1426_v53 = vmul.f32 -1.442695, %v967_v51  ;;  %v1427_v0 = vmul.f32 -1.442695, %v968_v43 }
 0x401   :  { %1522 = vpow2.f32 %v1426_v53 }
 0x402   :  { %1524 = vpow2.f32 %v1427_v0 }
 0x403   :  { %v964_v1 = vpop.f32.mrf.mxu3  ;;  %v944_v59 = vpop.f32.mrf.mxu2 }
 0x404   :  { %v970_v42 = vadd.f32 %v964_v1, %v886_v58  ;;  %v969_v21 = vadd.f32 %v944_v59, %v885_v39  ;;  %v1037_v1 = vld [vmem:[#allocation5 + $0xd0] sm:$0xff] }
 0x406   :  { %v1428_v60 = vmul.f32 -1.442695, %v970_v42 }
 0x407   :  { %v1523_v5 = vpop.eup %1522 }
 0x408   :  { %v1525_v13 = vpop.eup %1524  ;;  %v974_v52 = vadd.f32 1.0, %v1523_v5  ;;  %1526 = vpow2.f32 %v1428_v60 }
 0x409   :  { %v993_v57 = vadd.f32 1.0, %v1525_v13 }
 0x40a   :  { %1528 = vrcp.f32 %v974_v52  ;;  %v986_v54 = vand.u32 2147483648, %v974_v52  ;;  %v984_v16 = vand.u32 2147483647, %v974_v52  ;;  %vm980_vm14 = vweird.f32 %v974_v52 }
 0x40b   :  { %1530 = vrcp.f32 %v993_v57  ;;  %v1005_v3 = vand.u32 2147483648, %v993_v57  ;;  %v1003_v9 = vand.u32 2147483647, %v993_v57  ;;  %vm999_vm15 = vweird.f32 %v993_v57 }
 0x40c   :  { %v987_v19 = vor.u32 1.1754944e-38, %v986_v54  ;;  %vm985_vm2 = vcmp.eq.f32.partialorder %v984_v16, 8.507059e+37 }
 0x40d   :  { %v1006_v22 = vor.u32 1.1754944e-38, %v1005_v3  ;;  %vm1004_vm3 = vcmp.eq.f32.partialorder %v1003_v9, 8.507059e+37 }
 0x40e   :  { %v1527_v12 = vpop.eup %1526 }
 0x40f   :  { %v1013_v7 = vadd.f32 1.0, %v1527_v12 }
 0x410   :  { %v1529_v14 = vpop.eup %1528 }
 0x411   :  { %v1531_v18 = vpop.eup %1530  ;;  %v976_v10 = vmul.f32 %v1529_v14, %v974_v52  ;;  %1532 = vrcp.f32 %v1013_v7  ;;  %vm981_vm12 = vweird.f32 %v1529_v14  ;;  %v1025_v34 = vand.u32 2147483648, %v1013_v7 }
 0x412   :  { %v995_v4 = vmul.f32 %v1531_v18, %v993_v57  ;;  %1534 = vtanh.f32 %v969_v21  ;;  %vm1000_vm13 = vweird.f32 %v1531_v18  ;;  %vm982_vm0 = vmor %vm980_vm14, %vm981_vm12  ;;  %vm1019_vm5 = vweird.f32 %v1013_v7 }
 0x413   :  { %v977_v17 = vsub.f32 1.0, %v976_v10  ;;  %vm1001_vm1 = vmor %vm999_vm15, %vm1000_vm13  ;;  %v1023_v36 = vand.u32 2147483647, %v1013_v7  ;;  %v1026_v44 = vor.u32 1.1754944e-38, %v1025_v34 }
 0x414   :  { %v996_v8 = vsub.f32 1.0, %v995_v4 }
 0x415   :  { %v978_v20 = vmul.f32 %v1529_v14, %v977_v17  ;;  %vm1024_vm7 = vcmp.eq.f32.partialorder %v1023_v36, 8.507059e+37  ;;  %v1358_v36 = vld [vmem:[%s2578_s2 + $0x70] sm:$0xff] }
 0x416   :  { %v997_v46 = vmul.f32 %v1531_v18, %v996_v8 }
 0x417   :  { %v1533_v15 = vpop.eup %1532  ;;  %v979_v6 = vadd.f32 %v1529_v14, %v978_v20 }
 0x418   :  { %v998_v11 = vadd.f32 %v1531_v18, %v997_v46  ;;  %v1015_v63 = vmul.f32 %v1533_v15, %v1013_v7  ;;  %v1535_v24 = vpop.eup %1534  ;;  %vm1020_vm4 = vweird.f32 %v1533_v15 }
 0x419   :  { %v983_v23 = vsel %vm982_vm0, %v1529_v14, %v979_v6  ;;  %vm1021_vm6 = vmor %vm1019_vm5, %vm1020_vm4 }
 0x41a   :  { %v988_v25 = vsel %vm985_vm2, %v987_v19, %v983_v23  ;;  %v1002_v26 = vsel %vm1001_vm1, %v1531_v18, %v998_v11  ;;  %v1016_v27 = vsub.f32 1.0, %v1015_v63 }
 0x41b   :  { %v1007_v28 = vsel %vm1004_vm3, %v1006_v22, %v1002_v26  ;;  %v1030_v29 = vmul.f32 %v1535_v24, %v988_v25 }
 0x41c   :  { %v1029_v30 = vmul.f32 %v1007_v28, %v2449_v2  ;;  %v1017_v31 = vmul.f32 %v1533_v15, %v1016_v27  ;;  %v1035_v2 = vld [vmem:[#allocation5 + $0xc0] sm:$0xff] }
 0x41e   :  { %v2517_v32 = vadd.f32 %v1030_v29, %v1029_v30  ;;  %v1018_v33 = vadd.f32 %v1533_v15, %v1017_v31 }
 0x420   :  { %1536 = vtanh.f32 %v2517_v32  ;;  %v1022_v40 = vsel %vm1021_vm6, %v1533_v15, %v1018_v33 }
 0x421   :  { %v1027_v61 = vsel %vm1024_vm7, %v1026_v44, %v1022_v40  ;;  %v1357_v40 = vld [vmem:[%s2578_s2 + $0x68] sm:$0xff]  ;;  %v1356_v44 = vld [vmem:[%s2578_s2 + $0x60] sm:$0xff] }
 0x426   :  { %v1537_v48 = vpop.eup %1536 }
 0x427   :  { %v1033_v45 = vmul.f32 %v1537_v48, %v1027_v61  ;;  %v1355_v48 = vld [vmem:[%s2578_s2 + $0x58] sm:$0xff]  ;;  %v1354_v61 = vld [vmem:[%s2578_s2 + $0x50] sm:$0xff] }
 0x429   :  { %1055 = vmatmul.f32.vlgmr.msra.gmra.mxu0 %v1033_v45  ;;  %1075 = vmatmul.f32.vlgmr.msra.gmra.mxu1 %v1033_v45 }
 0x42a   :  { %1095 = vmatmul.f32.vlgmr.msra.gmra.mxu2 %v1033_v45  ;;  %1115 = vmatmul.f32.vlgmr.msra.gmra.mxu3 %v1033_v45  ;;  %v1353_v45 = vld [vmem:[%s2578_s2 + $0x48] sm:$0xff] }
 0x4a6   :  { %v1056_v37 = vpop.f32.mrf.mxu0  ;;  %v1076_v38 = vpop.f32.mrf.mxu1 }
 0x4a7   :  { %v1119_v41 = vadd.f32 %v1056_v37, %v1035_v2  ;;  %v1120_v50 = vadd.f32 %v1076_v38, %v1036_v35  ;;  %v1352_v2 = vld [vmem:[%s2578_s2 + $0x40] sm:$0xff]  ;;  %v1351_v35 = vld [vmem:[%s2578_s2 + $0x38] sm:$0xff]  ;;  %v1188_v38 = vld [vmem:[#allocation5 + $0xe8] sm:$0xff] }
 0x4a8   :  { %v1187_v37 = vld [vmem:[#allocation5 + $0xe0] sm:$0xff] }
 0x4a9   :  { %v1429_v47 = vmul.f32 -1.442695, %v1119_v41  ;;  %v1430_v56 = vmul.f32 -1.442695, %v1120_v50  ;;  %v1350_v41 = vld [vmem:[%s2578_s2 + $0x30] sm:$0xff] }
 0x4ab   :  { %1538 = vpow2.f32 %v1429_v47 }
 0x4ac   :  { %1540 = vpow2.f32 %v1430_v56 }
 0x4ad   :  { %v1116_v62 = vpop.f32.mrf.mxu3  ;;  %v1096_v42 = vpop.f32.mrf.mxu2 }
 0x4ae   :  { %v1122_v55 = vadd.f32 %v1116_v62, %v1038_v49  ;;  %v1121_v52 = vadd.f32 %v1096_v42, %v1037_v1  ;;  %v1349_v62 = vld [vmem:[%s2578_s2 + $0x28] sm:$0xff] }
 0x4af   :  { %v1345_v42 = vld [vmem:[%s2578_s2 + $0x8] sm:$0xff] }
 0x4b0   :  { %v1431_v51 = vmul.f32 -1.442695, %v1122_v55 }
 0x4b1   :  { %v1539_v43 = vpop.eup %1538 }
 0x4b2   :  { %v1541_v53 = vpop.eup %1540  ;;  %v1126_v0 = vadd.f32 1.0, %v1539_v43  ;;  %1542 = vpow2.f32 %v1431_v51  ;;  %v1348_v43 = vld [vmem:[%s2578_s2 + $0x20] sm:$0xff] }
 0x4b3   :  { %v1145_v58 = vadd.f32 1.0, %v1541_v53  ;;  %v1347_v53 = vld [vmem:[%s2578_s2 + $0x18] sm:$0xff] }
 0x4b4   :  { %1544 = vrcp.f32 %v1126_v0  ;;  %v1138_v14 = vand.u32 2147483648, %v1126_v0  ;;  %v1136_v10 = vand.u32 2147483647, %v1126_v0  ;;  %vm1132_vm10 = vweird.f32 %v1126_v0 }
 0x4b5   :  { %1546 = vrcp.f32 %v1145_v58  ;;  %v1157_v21 = vand.u32 2147483648, %v1145_v58  ;;  %v1155_v17 = vand.u32 2147483647, %v1145_v58  ;;  %vm1151_vm11 = vweird.f32 %v1145_v58 }
 0x4b6   :  { %v1139_v3 = vor.u32 1.1754944e-38, %v1138_v14  ;;  %vm1137_vm14 = vcmp.eq.f32.partialorder %v1136_v10, 8.507059e+37 }
 0x4b7   :  { %v1158_v46 = vor.u32 1.1754944e-38, %v1157_v21  ;;  %vm1156_vm15 = vcmp.eq.f32.partialorder %v1155_v17, 8.507059e+37 }
 0x4b8   :  { %v1543_v60 = vpop.eup %1542 }
 0x4b9   :  { %v1165_v5 = vadd.f32 1.0, %v1543_v60 }
 0x4ba   :  { %v1545_v13 = vpop.eup %1544 }
 0x4bb   :  { %v1547_v57 = vpop.eup %1546  ;;  %v1128_v39 = vmul.f32 %v1545_v13, %v1126_v0  ;;  %1548 = vrcp.f32 %v1165_v5  ;;  %vm1133_vm8 = vweird.f32 %v1545_v13  ;;  %v1177_v27 = vand.u32 2147483648, %v1165_v5  ;;  %v1190_v0 = vld [vmem:[#allocation5 + $0xf8] sm:$0xff] }
 0x4bc   :  { %v1147_v59 = vmul.f32 %v1547_v57, %v1145_v58  ;;  %1550 = vtanh.f32 %v1121_v52  ;;  %vm1152_vm9 = vweird.f32 %v1547_v57  ;;  %vm1134_vm12 = vmor %vm1132_vm10, %vm1133_vm8  ;;  %vm1171_vm1 = vweird.f32 %v1165_v5  ;;  %v1346_v58 = vld [vmem:[%s2578_s2 + $0x10] sm:$0xff] }
 0x4bd   :  { %v1129_v12 = vsub.f32 1.0, %v1128_v39  ;;  %vm1153_vm13 = vmor %vm1151_vm11, %vm1152_vm9  ;;  %v1175_v28 = vand.u32 2147483647, %v1165_v5  ;;  %v1178_v30 = vor.u32 1.1754944e-38, %v1177_v27 }
 0x4be   :  { %v1148_v7 = vsub.f32 1.0, %v1147_v59 }
 0x4bf   :  { %v1130_v18 = vmul.f32 %v1545_v13, %v1129_v12  ;;  %vm1176_vm3 = vcmp.eq.f32.partialorder %v1175_v28, 8.507059e+37  ;;  %v1189_v12 = vld [vmem:[#allocation5 + $0xf0] sm:$0xff] }
 0x4c0   :  { %v1149_v4 = vmul.f32 %v1547_v57, %v1148_v7 }
 0x4c1   :  { %v1549_v8 = vpop.eup %1548  ;;  %v1131_v54 = vadd.f32 %v1545_v13, %v1130_v18 }
 0x4c2   :  { %v1150_v20 = vadd.f32 %v1547_v57, %v1149_v4  ;;  %v1167_v16 = vmul.f32 %v1549_v8, %v1165_v5  ;;  %v1551_v15 = vpop.eup %1550  ;;  %vm1172_vm0 = vweird.f32 %v1549_v8  ;;  %v1344_v5 = vld [vmem:[%s2578_s2] sm:$0xff] }
 0x4c3   :  { %v1135_v9 = vsel %vm1134_vm12, %v1545_v13, %v1131_v54  ;;  %vm1173_vm2 = vmor %vm1171_vm1, %vm1172_vm0 }
 0x4c4   :  { %v1140_v6 = vsel %vm1137_vm14, %v1139_v3, %v1135_v9  ;;  %v1154_v19 = vsel %vm1153_vm13, %v1547_v57, %v1150_v20  ;;  %v1168_v11 = vsub.f32 1.0, %v1167_v16 }
 0x4c5   :  { %v1159_v63 = vsel %vm1156_vm15, %v1158_v46, %v1154_v19  ;;  %v1182_v22 = vmul.f32 %v1551_v15, %v1140_v6 }
 0x4c6   :  { %v1181_v23 = vmul.f32 %v1159_v63, %v2517_v32  ;;  %v1169_v24 = vmul.f32 %v1549_v8, %v1168_v11  ;;  %v1359_v32 = vld [vmem:[%s2578_s2 + $0x78] sm:$0xff] }
 0x4c7   :  { %1364 = vmatpush.msra.mxu0 %v1359_v32 }
 0x4c8   :  { %v2521_v25 = vadd.f32 %v1182_v22, %v1181_v23  ;;  %v1170_v26 = vadd.f32 %v1549_v8, %v1169_v24 }
 0x4c9   :  { %1365 = vmatpush.msra.mxu0 %v1358_v36 }
 0x4ca   :  { %1552 = vtanh.f32 %v2521_v25  ;;  %v1174_v29 = vsel %vm1173_vm2, %v1549_v8, %v1170_v26 }
 0x4cb   :  { %v1179_v33 = vsel %vm1176_vm3, %v1178_v30, %v1174_v29  ;;  %1366 = vmatpush.msra.mxu0 %v1357_v40  ;;  %vm1403_vm3 = vcmask 7168  }
 0x4cd   :  { %1367 = vmatpush.msra.mxu0 %v1356_v44 }
 0x4cf   :  { %1368 = vmatpush.msra.mxu0 %v1355_v48 }
 0x4d0   :  { %v1553_v31 = vpop.eup %1552 }
 0x4d1   :  { %v1185_v34 = vmul.f32 %v1553_v31, %v1179_v33  ;;  %1369 = vmatpush.msra.mxu0 %v1354_v61 }
 0x4d3   :  { %1207 = vmatmul.f32.vlgmr.msrb.gmra.mxu0 %v1185_v34  ;;  %1227 = vmatmul.f32.vlgmr.msrb.gmra.mxu1 %v1185_v34 }
 0x4d4   :  { %1247 = vmatmul.f32.vlgmr.msrb.gmra.mxu2 %v1185_v34  ;;  %1267 = vmatmul.f32.vlgmr.msrb.gmra.mxu3 %v1185_v34 }
 0x4d5   :  { %1370 = vmatpush.msra.mxu0 %v1353_v45 }
 0x4d7   :  { %1371 = vmatpush.msra.mxu0 %v1352_v2 }
 0x4d9   :  { %1372 = vmatpush.msra.mxu0 %v1351_v35 }
 0x4db   :  { %1373 = vmatpush.msra.mxu0 %v1350_v41 }
 0x4dd   :  { %1374 = vmatpush.msra.mxu0 %v1349_v62 }
 0x4df   :  { %1375 = vmatpush.msra.mxu0 %v1348_v43 }
 0x4e1   :  { %1376 = vmatpush.msra.mxu0 %v1347_v53 }
 0x4e3   :  { %1377 = vmatpush.msra.mxu0 %v1346_v58 }
 0x4e5   :  { %1378 = vmatpush.msra.mxu0 %v1345_v42 }
 0x4e7   :  { %1379 = vmatpush.msra.mxu0 %v1344_v5 }
 0x550   :  { %v1208_v50 = vpop.f32.mrf.mxu0  ;;  %v1228_v47 = vpop.f32.mrf.mxu1 }
 0x551   :  { %v1271_v56 = vadd.f32 %v1208_v50, %v1187_v37  ;;  %v1272_v49 = vadd.f32 %v1228_v47, %v1188_v38  ;;  %v1441_v38 = vld [vmem:[#allocation4] ss:$0 sm:$0xff] }
 0x553   :  { %v1432_v55 = vmul.f32 -1.442695, %v1271_v56  ;;  %v1433_v51 = vmul.f32 -1.442695, %v1272_v49 }
 0x555   :  { %1554 = vpow2.f32 %v1432_v55 }
 0x556   :  { %1556 = vpow2.f32 %v1433_v51 }
 0x557   :  { %v1268_v1 = vpop.f32.mrf.mxu3  ;;  %v1248_v7 = vpop.f32.mrf.mxu2 }
 0x558   :  { %v1274_v60 = vadd.f32 %v1268_v1, %v1190_v0  ;;  %v1273_v10 = vadd.f32 %v1248_v7, %v1189_v12 }
 0x55a   :  { %v1434_v13 = vmul.f32 -1.442695, %v1274_v60 }
 0x55b   :  { %v1555_v52 = vpop.eup %1554 }
 0x55c   :  { %v1557_v57 = vpop.eup %1556  ;;  %v1278_v39 = vadd.f32 1.0, %v1555_v52  ;;  %1558 = vpow2.f32 %v1434_v13 }
 0x55d   :  { %v1297_v59 = vadd.f32 1.0, %v1557_v57 }
 0x55e   :  { %1560 = vrcp.f32 %v1278_v39  ;;  %v1290_v20 = vand.u32 2147483648, %v1278_v39  ;;  %v1288_v9 = vand.u32 2147483647, %v1278_v39  ;;  %vm1284_vm6 = vweird.f32 %v1278_v39 }
 0x55f   :  { %1562 = vrcp.f32 %v1297_v59  ;;  %v1309_v16 = vand.u32 2147483648, %v1297_v59  ;;  %v1307_v6 = vand.u32 2147483647, %v1297_v59  ;;  %vm1303_vm7 = vweird.f32 %v1297_v59 }
 0x560   :  { %v1291_v63 = vor.u32 1.1754944e-38, %v1290_v20  ;;  %vm1289_vm10 = vcmp.eq.f32.partialorder %v1288_v9, 8.507059e+37 }
 0x561   :  { %v1310_v24 = vor.u32 1.1754944e-38, %v1309_v16  ;;  %vm1308_vm11 = vcmp.eq.f32.partialorder %v1307_v6, 8.507059e+37 }
 0x562   :  { %v1559_v14 = vpop.eup %1558 }
 0x563   :  { %v1317_v21 = vadd.f32 1.0, %v1559_v14 }
 0x564   :  { %v1561_v18 = vpop.eup %1560 }
 0x565   :  { %v1563_v4 = vpop.eup %1562  ;;  %v1280_v17 = vmul.f32 %v1561_v18, %v1278_v39  ;;  %1564 = vrcp.f32 %v1317_v21  ;;  %vm1285_vm4 = vweird.f32 %v1561_v18  ;;  %v1329_v44 = vand.u32 2147483648, %v1317_v21 }
 0x566   :  { %v1299_v8 = vmul.f32 %v1563_v4, %v1297_v59  ;;  %1566 = vtanh.f32 %v1273_v10  ;;  %vm1304_vm5 = vweird.f32 %v1563_v4  ;;  %vm1286_vm8 = vmor %vm1284_vm6, %vm1285_vm4  ;;  %vm1323_vm13 = vweird.f32 %v1317_v21 }
 0x567   :  { %v1281_v54 = vsub.f32 1.0, %v1280_v17  ;;  %vm1305_vm9 = vmor %vm1303_vm7, %vm1304_vm5  ;;  %v1327_v48 = vand.u32 2147483647, %v1317_v21  ;;  %v1330_v45 = vor.u32 1.1754944e-38, %v1329_v44 }
 0x568   :  { %v1300_v3 = vsub.f32 1.0, %v1299_v8 }
 0x569   :  { %v1282_v46 = vmul.f32 %v1561_v18, %v1281_v54  ;;  %vm1328_vm15 = vcmp.eq.f32.partialorder %v1327_v48, 8.507059e+37 }
 0x56a   :  { %v1301_v15 = vmul.f32 %v1563_v4, %v1300_v3 }
 0x56b   :  { %v1565_v19 = vpop.eup %1564  ;;  %v1283_v11 = vadd.f32 %v1561_v18, %v1282_v46 }
 0x56c   :  { %v1302_v22 = vadd.f32 %v1563_v4, %v1301_v15  ;;  %v1319_v23 = vmul.f32 %v1565_v19, %v1317_v21  ;;  %v1567_v27 = vpop.eup %1566  ;;  %vm1324_vm12 = vweird.f32 %v1565_v19 }
 0x56d   :  { %v1287_v26 = vsel %vm1286_vm8, %v1561_v18, %v1283_v11  ;;  %vm1325_vm14 = vmor %vm1323_vm13, %vm1324_vm12 }
 0x56e   :  { %v1292_v28 = vsel %vm1289_vm10, %v1291_v63, %v1287_v26  ;;  %v1306_v29 = vsel %vm1305_vm9, %v1563_v4, %v1302_v22  ;;  %v1320_v30 = vsub.f32 1.0, %v1319_v23 }
 0x56f   :  { %v1311_v31 = vsel %vm1308_vm11, %v1310_v24, %v1306_v29  ;;  %v1334_v33 = vmul.f32 %v1567_v27, %v1292_v28 }
 0x570   :  { %v1333_v34 = vmul.f32 %v1311_v31, %v2521_v25  ;;  %v1321_v32 = vmul.f32 %v1565_v19, %v1320_v30 }
 0x572   :  { %v1335_v36 = vadd.f32 %v1334_v33, %v1333_v34  ;;  %v1322_v40 = vadd.f32 %v1565_v19, %v1321_v32 }
 0x574   :  { %1568 = vtanh.f32 %v1335_v36  ;;  %v1326_v61 = vsel %vm1325_vm14, %v1565_v19, %v1322_v40 }
 0x575   :  { %v1331_v35 = vsel %vm1328_vm15, %v1330_v45, %v1326_v61 }
 0x57a   :  { %v1569_v2 = vpop.eup %1568 }
 0x57b   :  { %v1337_v37 = vmul.f32 %v1569_v2, %v1331_v35 }
 0x57d   :  { %1380 = vmatmul.f32.vlgmr.msra.gmra.mxu0 %v1337_v37 }
 0x5fa   :  { %v1381_v41 = vpop.f32.mrf.mxu0 }
 0x5fb   :  { %v1382_v50 = vadd.f32 %v1441_v38, %v1381_v41 }
 0x5fd   :  { %v1435_v25 = vmul.f32 -1.442695, %v1382_v50 }
 0x5ff   :  { %1570 = vpow2.f32 %v1435_v25 }
 0x605   :  { %v1571_v47 = vpop.eup %1570 }
 0x606   :  { %v1387_v56 = vadd.f32 1.0, %v1571_v47 }
 0x608   :  { %1572 = vrcp.f32 %v1387_v56  ;;  %v1399_v51 = vand.u32 2147483648, %v1387_v56  ;;  %v1397_v53 = vand.u32 2147483647, %v1387_v56  ;;  %vm1393_vm1 = vweird.f32 %v1387_v56 }
 0x60a   :  { %v1400_v58 = vor.u32 1.1754944e-38, %v1399_v51  ;;  %vm1398_vm4 = vcmp.eq.f32.partialorder %v1397_v53, 8.507059e+37 }
 0x60e   :  { %v1573_v49 = vpop.eup %1572 }
 0x60f   :  { %v1389_v62 = vmul.f32 %v1573_v49, %v1387_v56  ;;  %vm1394_vm0 = vweird.f32 %v1573_v49 }
 0x610   :  { %vm1395_vm2 = vmor %vm1393_vm1, %vm1394_vm0 }
 0x611   :  { %v1390_v55 = vsub.f32 1.0, %v1389_v62 }
 0x613   :  { %v1391_v43 = vmul.f32 %v1573_v49, %v1390_v55 }
 0x615   :  { %v1392_v0 = vadd.f32 %v1573_v49, %v1391_v43 }
 0x617   :  { %v1396_v1 = vsel %vm1395_vm2, %v1573_v49, %v1392_v0 }
 0x618   :  { %v1401_v42 = vsel %vm1398_vm4, %v1400_v58, %v1396_v1 }
 0x619   :  { %1404 = vst.msk [vmem:[%s2580_s4] sm:$0xff] %vm1403_vm3, %v1401_v42 }
 0x61a   :  { %1409 = vsyncpa [#allocation6], 1 }
 0x61b   :  { %1410 = vsyncpa [#allocation8], 1 }

</bundles_post_ra>
